<compile_context>
chip_gen: v7x
topology: tpu7x:2x2x1
jax: 0.10.0
libtpu: 0.0.40
codegen_flags: <defaults>
</compile_context>

<pallas_src>
import functools

import jax
import jax.numpy as jnp
from jax import lax
from jax.experimental import pallas as pl
from jax.experimental.pallas import tpu as pltpu


def _round_up(x, m):
    return ((x + m - 1) // m) * m


def _vmem_limit_bytes():
    """Per-generation VMEM budget (v7x has 64 MiB/TensorCore, v5e/v6e 128 MiB)."""
    cap = None
    try:
        info = pltpu.get_tpu_info()
        cap = getattr(info, "vmem_capacity_bytes", None)
    except Exception:
        cap = None
    if not cap:
        cap = 64 * 1024 * 1024  # conservative: smallest (v7x per-core) capacity
    return int(min(cap * 3 // 4, 100 * 1024 * 1024))


def _num_tensorcores():
    """Best-effort TensorCore count (megacore / v7x sharding); fallback 1 (v5e/v6e)."""
    try:
        info = pltpu.get_tpu_info()
        for name in ("num_cores", "core_count", "num_tensorcores",
                     "tensorcores_per_chip"):
            v = getattr(info, name, None)
            if isinstance(v, int) and v > 0:
                return v
    except Exception:
        pass
    try:
        dev = jax.devices()[0]
        for name in ("num_cores", "core_count"):
            v = getattr(dev, name, None)
            if isinstance(v, int) and v > 0:
                return v
    except Exception:
        pass
    return 1


# -----------------------------------------------------------------------------
# Kernel: one GEMM for all phases (+ masked per-(phase,channel) BN partial sums)
#   grid = (n_splits [parallel], m_tiles [arbitrary])
# -----------------------------------------------------------------------------
def _make_gemm_bn_kernel(n_phases, cout):
    def kernel(bt_ref, at_ref, mask_ref, yt_ref, sum_ref, sumsq_ref):
        @pl.when(pl.program_id(1) == 0)
        def _():
            sum_ref[...] = jnp.zeros_like(sum_ref)
            sumsq_ref[...] = jnp.zeros_like(sumsq_ref)

        # (P*Cout, Kp) @ (Kp, tile_m) -> f32 (P*Cout, tile_m).  The structural
        # zeros in B^T keep phases independent; the MXU has huge slack because
        # the kernel is HBM-bound, so the low occupancy at Cout=8 is free.
        yt_ref[...] = jnp.dot(bt_ref[...], at_ref[...],
                              preferred_element_type=jnp.float32)

        # BatchNorm partial sums over VALID output positions only (per-phase
        # {0,1} mask excludes the halo columns of the padded output grid).
        for p in range(n_phases):  # static unroll; n_phases = s**3 is small
            m_p = mask_ref[pl.ds(p, 1), :].astype(jnp.float32)          # (1, T)
            blk = yt_ref[pl.ds(p * cout, cout), :] * m_p                # (C, T)
            sum_ref[pl.ds(p * cout, cout), :] += jnp.sum(
                blk, axis=1, keepdims=True)
            sumsq_ref[pl.ds(p * cout, cout), :] += jnp.sum(
                blk * blk, axis=1, keepdims=True)

    return kernel


def deconv3d_bn_relu(x, weight, gamma, beta, *, stride=2, padding=1,
                     output_padding=1, eps=1e-5, tile_m=4096, n_splits=None):
    """x: (N, Cin, D, H, W) NCDHW.  weight: (Cin, Cout, K, K, K) (torch layout)."""
    N, Cin, D, H, W = x.shape
    Cin_w, Cout, K, _, _ = weight.shape
    assert Cin == Cin_w
    s = int(stride)
    pad_lo = K - 1 - padding
    assert pad_lo >= 0, "requires padding <= kernel_size - 1"
    assert output_padding < s, "torch requires output_padding < stride"
    Do = (D - 1) * s - 2 * padding + K + output_padding
    Ho = (H - 1) * s - 2 * padding + K + output_padding
    Wo = (W - 1) * s - 2 * padding + K + output_padding

    # ---- polyphase tap tables (trace-time Python, per spatial dim) -----------
    # For output index o = q*s + r, only kernel taps k with (r + k - pad_lo) % s
    # == 0 contribute, reading input index q + (r + k - pad_lo)//s.
    def phase_table(in_dim, out_dim):
        taps, counts = [], []
        lo_need, hi_need = 0, in_dim - 1
        for r in range(s):
            tk = [(k, (r + k - pad_lo) // s) for k in range(K)
                  if (r + k - pad_lo) % s == 0]
            q = (out_dim - r + s - 1) // s if out_dim > r else 0
            taps.append(tk)
            counts.append(q)
            if q > 0:
                for _, off in tk:
                    lo_need = min(lo_need, off)
                    hi_need = max(hi_need, q - 1 + off)
        return taps, counts, max(0, -lo_need), max(0, hi_need - (in_dim - 1))

    taps_d, q_d, dlo, dhi = phase_table(D, Do)
    taps_h, q_h, hlo, hhi = phase_table(H, Ho)
    taps_w, q_w, wlo, whi = phase_table(W, Wo)

    # Padded per-phase output grid extents (>= every phase extent, >= input+halo)
    Dp = max(D + dlo + dhi, max(q_d))
    Hp = max(H + hlo + hhi, max(q_h))
    Wp = max(W + wlo + whi, max(q_w))

    # Per-dim union of tap offsets (phases with nonzero extent only).
    def union_offsets(taps, counts):
        offs = sorted({off for r in range(s) if counts[r] > 0
                       for (_, off) in taps[r]})
        return offs if offs else [0]

    offs_d = union_offsets(taps_d, q_d)
    offs_h = union_offsets(taps_h, q_h)
    offs_w = union_offsets(taps_w, q_w)
    u_index, bases = {}, []
    for a, od in enumerate(offs_d):
        for b, oh in enumerate(offs_h):
            for c, ow in enumerate(offs_w):
                u_index[(od, oh, ow)] = len(bases)
                bases.append((od + dlo) * Hp * Wp + (oh + hlo) * Wp + (ow + wlo))
    U = len(bases)

    P = s ** 3
    PC = P * Cout
    Kp = U * Cin
    Kp_pad = _round_up(Kp, 16)  # bf16 sublane packing

    # ---- hardware-adaptive tiling --------------------------------------------
    if n_splits is None:
        n_splits = _num_tensorcores()
    vmem_limit = _vmem_limit_bytes()
    Mfull = N * Dp * Hp * Wp
    tile = min(int(tile_m), max(512, _round_up(Mfull, 512)))
    tile = _round_up(tile, 512)

    def _working_set(t):  # double-buffered per-step VMEM bytes (approx)
        return (2 * t * (Kp_pad * 2 + P * 2 + PC * 4)
                + 4 * PC * 128 * 4 + 2 * PC * Kp_pad * 2)

    while tile > 512 and _working_set(tile) > vmem_limit // 2:
        tile //= 2
    chunk = n_splits * tile
    Mp = _round_up(Mfull, chunk)
    m_tiles = Mp // chunk

    # ---- XLA glue: flat channels-major input + union-tap A^T ------------------
    xt = jnp.transpose(x, (1, 0, 2, 3, 4)).astype(jnp.bfloat16)  # (Cin,N,D,H,W)
    xpad = jnp.pad(xt, ((0, 0), (0, 0), (dlo, Dp - D - dlo),
                        (hlo, Hp - H - hlo), (wlo, Wp - W - wlo)))
    base_max = max(bases)
    xflat = jnp.pad(xpad.reshape(Cin, Mfull),
                    ((0, 0), (0, Mp + base_max - Mfull)))
    # Every tap offset is a constant shift of the flat index over the padded
    # grid, so A^T is just U shifted slices of xflat (read once by the kernel).
    # TODO(synk): this remaining U*Cin-row materialization could be removed
    # entirely by gathering the shifted slices in-kernel (pl.ANY xflat +
    # pltpu.make_async_copy); it is a modest fraction of total HBM traffic.
    At = jnp.concatenate([xflat[:, b:b + Mp] for b in bases], axis=0)
    if Kp_pad > Kp:
        At = jnp.pad(At, ((0, Kp_pad - Kp), (0, 0)))

    # B^T (P*Cout, Kp_pad): row block p holds that phase's flipped kernel taps.
    wf = weight.astype(jnp.float32)
    Bt = jnp.zeros((PC, Kp_pad), jnp.float32)
    phases = [(rd, rh, rw) for rd in range(s) for rh in range(s) for rw in range(s)]
    for p_idx, (rd, rh, rw) in enumerate(phases):
        if q_d[rd] == 0 or q_h[rh] == 0 or q_w[rw] == 0:
            continue  # empty phase: conv output is exactly zero there
        for (kd, od) in taps_d[rd]:
            for (kh, oh) in taps_h[rh]:
                for (kw, ow) in taps_w[rw]:
                    u = u_index[(od, oh, ow)]
                    coef = wf[:, :, K - 1 - kd, K - 1 - kh, K - 1 - kw]  # (Cin,Cout)
                    Bt = Bt.at[p_idx * Cout:(p_idx + 1) * Cout,
                               u * Cin:(u + 1) * Cin].set(coef.T)
    Bt = Bt.astype(jnp.bfloat16)

    # Per-phase validity masks over the padded grid (for stats; halo columns of
    # y^T are garbage but are never selected by the final depth-to-space slice).
    qd_i = lax.broadcasted_iota(jnp.int32, (N, Dp, Hp, Wp), 1)
    qh_i = lax.broadcasted_iota(jnp.int32, (N, Dp, Hp, Wp), 2)
    qw_i = lax.broadcasted_iota(jnp.int32, (N, Dp, Hp, Wp), 3)
    masks = [((qd_i < q_d[rd]) & (qh_i < q_h[rh]) & (qw_i < q_w[rw])
              ).reshape(Mfull) for (rd, rh, rw) in phases]
    mask = jnp.pad(jnp.stack(masks, axis=0),
                   ((0, 0), (0, Mp - Mfull))).astype(jnp.bfloat16)  # (P, Mp)

    # ---- Pallas: one GEMM for all phases + masked BN partial sums -------------
    kernel = _make_gemm_bn_kernel(P, Cout)
    cost = pl.CostEstimate(
        flops=2 * PC * Kp_pad * Mp + 4 * PC * Mp,
        transcendentals=0,
        bytes_accessed=(At.size * 2 + Bt.size * 2 + mask.size * 2
                        + PC * Mp * 4 + 2 * PC * n_splits * 128 * 4))

    # NOTE: if profiles show exposed first-tile DMA, add
    # pipeline_mode=pl.Buffered(3) on the A^T / mask in_specs.
    yt, psum, psumsq = pl.pallas_call(
        kernel,
        out_shape=(jax.ShapeDtypeStruct((PC, Mp), jnp.float32),
                   jax.ShapeDtypeStruct((PC, n_splits * 128), jnp.float32),
                   jax.ShapeDtypeStruct((PC, n_splits * 128), jnp.float32)),
        grid=(n_splits, m_tiles),
        in_specs=[
            pl.BlockSpec((PC, Kp_pad), lambda c, i: (0, 0)),          # B^T resident
            pl.BlockSpec((Kp_pad, tile), lambda c, i: (0, i * n_splits + c)),
            pl.BlockSpec((P, tile), lambda c, i: (0, i * n_splits + c)),
        ],
        out_specs=(
            pl.BlockSpec((PC, tile), lambda c, i: (0, i * n_splits + c)),
            pl.BlockSpec((PC, 128), lambda c, i: (0, c)),
            pl.BlockSpec((PC, 128), lambda c, i: (0, c)),
        ),
        compiler_params=pltpu.CompilerParams(
            dimension_semantics=("parallel", "arbitrary"),
            vmem_limit_bytes=vmem_limit),
        cost_estimate=cost,
    )(Bt, At, mask)

    # ---- BatchNorm statistics (train mode, biased variance) -------------------
    M_valid = N * Do * Ho * Wo
    total_sum = jnp.sum(psum[:, ::128], axis=1).reshape(P, Cout).sum(axis=0)
    total_sumsq = jnp.sum(psumsq[:, ::128], axis=1).reshape(P, Cout).sum(axis=0)
    mean = total_sum / M_valid
    # NOTE: E[y^2] - E[y]^2 in f32 can cancel when |mean| >> std; acceptable here.
    var = jnp.maximum(total_sumsq / M_valid - mean * mean, 0.0)
    scale = gamma.astype(jnp.float32) / jnp.sqrt(var + eps)
    shift = beta.astype(jnp.float32) - mean * scale
    # TODO(synk): BatchNorm3d's running_mean/running_var buffer updates (training
    # side effect with no impact on this forward output) are not reproduced.

    # ---- epilogue (XLA-fused): affine + ReLU + depth-to-space, single read ----
    y = yt[:, :Mfull].reshape(P, Cout, N, Dp, Hp, Wp)
    y = y * scale.reshape(1, Cout, 1, 1, 1, 1) + shift.reshape(1, Cout, 1, 1, 1, 1)
    y = jnp.maximum(y, 0.0)
    y = y.reshape(s, s, s, Cout, N, Dp, Hp, Wp)
    out = jnp.transpose(y, (4, 3, 5, 0, 6, 1, 7, 2)).reshape(
        N, Cout, Dp * s, Hp * s, Wp * s)
    return out[:, :, :Do, :Ho, :Wo]


# -----------------------------------------------------------------------------
# Pure-JAX reference (independent path: lax.conv_general_dilated).
# -----------------------------------------------------------------------------
def deconv3d_bn_relu_ref(x, weight, gamma, beta, *, stride, padding,
                         output_padding, eps=1e-5):
    K = weight.shape[2]
    rhs = jnp.transpose(weight[:, :, ::-1, ::-1, ::-1], (1, 0, 2, 3, 4))  # OIDHW
    pad_lo = K - 1 - padding
    pad_hi = K - 1 - padding + output_padding
    out = lax.conv_general_dilated(
        x.astype(jnp.float32), rhs.astype(jnp.float32),
        window_strides=(1, 1, 1),
        padding=[(pad_lo, pad_hi)] * 3,
        lhs_dilation=(stride,) * 3,
        dimension_numbers=("NCDHW", "OIDHW", "NCDHW"),
        precision=lax.Precision.HIGHEST)
    mean = out.mean(axis=(0, 2, 3, 4), keepdims=True)
    var = out.var(axis=(0, 2, 3, 4), keepdims=True)
    g = gamma.reshape(1, -1, 1, 1, 1).astype(jnp.float32)
    b = beta.reshape(1, -1, 1, 1, 1).astype(jnp.float32)
    out = (out - mean) / jnp.sqrt(var + eps) * g + b
    return jnp.maximum(out, 0.0)


if __name__ == "__main__":
    key = jax.random.PRNGKey(0)
    k_x, k_w = jax.random.split(key, 2)

    # Deconv3d(in_channels=4, out_channels=8, kernel_size=3, stride=2, padding=1,
    #          output_padding=1, normalization='batch', nonlinearity='relu')
    N, Cin, Cout, D, H, W, K = 2, 4, 8, 8, 8, 8, 3
    stride, padding, output_padding = 2, 1, 1

    x = jax.random.normal(k_x, (N, Cin, D, H, W), jnp.float32)
    # torch ConvTranspose3d weight layout: (in_channels, out_channels, K, K, K)
    weight = (jax.random.normal(k_w, (Cin, Cout, K, K, K), jnp.float32)
              / jnp.sqrt(Cin * K ** 3))
    # BatchNorm3d affine init (weight=1, bias=0); bias-less conv (normalization='batch')
    gamma = jnp.ones((Cout,), jnp.float32)
    beta = jnp.zeros((Cout,), jnp.float32)

    fwd = jax.jit(functools.partial(deconv3d_bn_relu, stride=stride,
                                    padding=padding,
                                    output_padding=output_padding))
    out = jax.block_until_ready(fwd(x, weight, gamma, beta))
    assert out.shape == (N, Cout, 2 * D, 2 * H, 2 * W), out.shape

    ref = deconv3d_bn_relu_ref(x, weight, gamma, beta, stride=stride,
                               padding=padding, output_padding=output_padding)
    # bf16 GEMM operands -> slightly looser tolerance than pure f32.
    assert jnp.allclose(out, ref, atol=2e-2, rtol=2e-2), \
        float(jnp.max(jnp.abs(out - ref)))

    print("KERNEL_OK")
</pallas_src>

<mosaic_0001>
module attributes {stable_mosaic.version = 11 : i64} {
  func.func @kernel(%arg0: i32, %arg1: i32, %arg2: memref<64x32xbf16, #tpu.memory_space<vmem>>, %arg3: memref<32x1536xbf16, #tpu.memory_space<vmem>>, %arg4: memref<8x1536xbf16, #tpu.memory_space<vmem>>, %arg5: memref<64x1536xf32, #tpu.memory_space<vmem>>, %arg6: memref<64x128xf32, #tpu.memory_space<vmem>>, %arg7: memref<64x128xf32, #tpu.memory_space<vmem>>) attributes {dimension_semantics = [#tpu.dimension_semantics<parallel>, #tpu.dimension_semantics<arbitrary>], iteration_bounds = array<i64: 1, 1>, scalar_prefetch = 0 : i64, scratch_operands = 0 : i64, tpu.core_type = #tpu.core_type<tc>, window_params = [{pipeline_mode = #tpu.pipeline_mode<synchronous>, transform_indices = @transform_0, window_bounds = array<i64: 64, 32>}, {transform_indices = @transform_1, window_bounds = array<i64: 32, 1536>}, {transform_indices = @transform_2, window_bounds = array<i64: 8, 1536>}, {transform_indices = @transform_3, window_bounds = array<i64: 64, 1536>}, {transform_indices = @transform_4, window_bounds = array<i64: 64, 128>}, {transform_indices = @transform_5, window_bounds = array<i64: 64, 128>}]} {
    %c0_i32 = arith.constant 0 : i32
    %0 = arith.cmpi eq, %arg1, %c0_i32 : i32
    %1 = arith.extui %0 : i1 to i32
    %c0_i32_0 = arith.constant 0 : i32
    %2 = arith.cmpi ne, %1, %c0_i32_0 : i32
    scf.if %2 {
      %cst_104 = arith.constant 0.000000e+00 : f32
      %151 = vector.broadcast %cst_104 : f32 to vector<64x128xf32>
      %c0_105 = arith.constant 0 : index
      %c0_106 = arith.constant 0 : index
      %152 = vector.load %arg6[%c0_105, %c0_106] : memref<64x128xf32, #tpu.memory_space<vmem>>, vector<64x128xf32>
      tpu.vector_store %arg6[%c0_105, %c0_106], %151 {strides = array<i32>} : memref<64x128xf32, #tpu.memory_space<vmem>>, vector<64x128xf32>,
      %cst_107 = arith.constant 0.000000e+00 : f32
      %153 = vector.broadcast %cst_107 : f32 to vector<64x128xf32>
      %c0_108 = arith.constant 0 : index
      %c0_109 = arith.constant 0 : index
      %154 = vector.load %arg7[%c0_108, %c0_109] : memref<64x128xf32, #tpu.memory_space<vmem>>, vector<64x128xf32>
      tpu.vector_store %arg7[%c0_108, %c0_109], %153 {strides = array<i32>} : memref<64x128xf32, #tpu.memory_space<vmem>>, vector<64x128xf32>,
    } else {
    }
    %c0 = arith.constant 0 : index
    %c0_1 = arith.constant 0 : index
    %3 = vector.load %arg2[%c0, %c0_1] : memref<64x32xbf16, #tpu.memory_space<vmem>>, vector<64x32xbf16>
    %c0_2 = arith.constant 0 : index
    %c0_3 = arith.constant 0 : index
    %4 = vector.load %arg3[%c0_2, %c0_3] : memref<32x1536xbf16, #tpu.memory_space<vmem>>, vector<32x1536xbf16>
    %cst = arith.constant dense<0.000000e+00> : vector<64x1536xf32>
    %5 = tpu.matmul %3, %4, %cst {dimension_numbers = #tpu.dot_dimension_numbers<[1], [0], [0], [1], [0, 0, 1, 1], [], []>} : vector<64x32xbf16>, vector<32x1536xbf16>, vector<64x1536xf32> -> vector<64x1536xf32>
    %c0_4 = arith.constant 0 : index
    %c0_5 = arith.constant 0 : index
    %6 = vector.load %arg5[%c0_4, %c0_5] : memref<64x1536xf32, #tpu.memory_space<vmem>>, vector<64x1536xf32>
    tpu.vector_store %arg5[%c0_4, %c0_5], %5 {strides = array<i32>} : memref<64x1536xf32, #tpu.memory_space<vmem>>, vector<64x1536xf32>,
    %c0_6 = arith.constant 0 : index
    %c0_7 = arith.constant 0 : index
    %7 = vector.load %arg4[%c0_6, %c0_7] : memref<8x1536xbf16, #tpu.memory_space<vmem>>, vector<1x1536xbf16>
    %8 = arith.extf %7 : vector<1x1536xbf16> to vector<1x1536xf32>
    %c0_8 = arith.constant 0 : index
    %c0_9 = arith.constant 0 : index
    %9 = vector.load %arg5[%c0_8, %c0_9] : memref<64x1536xf32, #tpu.memory_space<vmem>>, vector<8x1536xf32>
    %10 = vector.broadcast %8 : vector<1x1536xf32> to vector<8x1536xf32>
    %11 = arith.mulf %9, %10 : vector<8x1536xf32>
    %c0_10 = arith.constant 0 : index
    %c0_11 = arith.constant 0 : index
    %12 = vector.load %arg6[%c0_10, %c0_11] : memref<64x128xf32, #tpu.memory_space<vmem>>, vector<8x128xf32>
    %cst_12 = arith.constant dense<0.000000e+00> : vector<8xf32>
    %13 = vector.multi_reduction <add>, %11, %cst_12 [1] : vector<8x1536xf32> to vector<8xf32>
    %14 = vector.shape_cast %13 : vector<8xf32> to vector<8x1xf32>
    %15 = vector.broadcast %14 : vector<8x1xf32> to vector<8x128xf32>
    %16 = arith.addf %12, %15 : vector<8x128xf32>
    %c0_13 = arith.constant 0 : index
    %c0_14 = arith.constant 0 : index
    %17 = vector.load %arg6[%c0_13, %c0_14] : memref<64x128xf32, #tpu.memory_space<vmem>>, vector<8x128xf32>
    tpu.vector_store %arg6[%c0_13, %c0_14], %16 {strides = array<i32>} : memref<64x128xf32, #tpu.memory_space<vmem>>, vector<8x128xf32>,
    %c0_15 = arith.constant 0 : index
    %c0_16 = arith.constant 0 : index
    %18 = vector.load %arg7[%c0_15, %c0_16] : memref<64x128xf32, #tpu.memory_space<vmem>>, vector<8x128xf32>
    %19 = arith.mulf %11, %11 : vector<8x1536xf32>
    %cst_17 = arith.constant dense<0.000000e+00> : vector<8xf32>
    %20 = vector.multi_reduction <add>, %19, %cst_17 [1] : vector<8x1536xf32> to vector<8xf32>
    %21 = vector.shape_cast %20 : vector<8xf32> to vector<8x1xf32>
    %22 = vector.broadcast %21 : vector<8x1xf32> to vector<8x128xf32>
    %23 = arith.addf %18, %22 : vector<8x128xf32>
    %c0_18 = arith.constant 0 : index
    %c0_19 = arith.constant 0 : index
    %24 = vector.load %arg7[%c0_18, %c0_19] : memref<64x128xf32, #tpu.memory_space<vmem>>, vector<8x128xf32>
    tpu.vector_store %arg7[%c0_18, %c0_19], %23 {strides = array<i32>} : memref<64x128xf32, #tpu.memory_space<vmem>>, vector<8x128xf32>,
    %c1 = arith.constant 1 : index
    %c0_20 = arith.constant 0 : index
    %25 = vector.load %arg4[%c1, %c0_20] : memref<8x1536xbf16, #tpu.memory_space<vmem>>, vector<1x1536xbf16>
    %26 = arith.extf %25 : vector<1x1536xbf16> to vector<1x1536xf32>
    %c8 = arith.constant 8 : index
    %c0_21 = arith.constant 0 : index
    %27 = vector.load %arg5[%c8, %c0_21] : memref<64x1536xf32, #tpu.memory_space<vmem>>, vector<8x1536xf32>
    %28 = vector.broadcast %26 : vector<1x1536xf32> to vector<8x1536xf32>
    %29 = arith.mulf %27, %28 : vector<8x1536xf32>
    %c8_22 = arith.constant 8 : index
    %c0_23 = arith.constant 0 : index
    %30 = vector.load %arg6[%c8_22, %c0_23] : memref<64x128xf32, #tpu.memory_space<vmem>>, vector<8x128xf32>
    %cst_24 = arith.constant dense<0.000000e+00> : vector<8xf32>
    %31 = vector.multi_reduction <add>, %29, %cst_24 [1] : vector<8x1536xf32> to vector<8xf32>
    %32 = vector.shape_cast %31 : vector<8xf32> to vector<8x1xf32>
    %33 = vector.broadcast %32 : vector<8x1xf32> to vector<8x128xf32>
    %34 = arith.addf %30, %33 : vector<8x128xf32>
    %c8_25 = arith.constant 8 : index
    %c0_26 = arith.constant 0 : index
    %35 = vector.load %arg6[%c8_25, %c0_26] : memref<64x128xf32, #tpu.memory_space<vmem>>, vector<8x128xf32>
    tpu.vector_store %arg6[%c8_25, %c0_26], %34 {strides = array<i32>} : memref<64x128xf32, #tpu.memory_space<vmem>>, vector<8x128xf32>,
    %c8_27 = arith.constant 8 : index
    %c0_28 = arith.constant 0 : index
    %36 = vector.load %arg7[%c8_27, %c0_28] : memref<64x128xf32, #tpu.memory_space<vmem>>, vector<8x128xf32>
    %37 = arith.mulf %29, %29 : vector<8x1536xf32>
    %cst_29 = arith.constant dense<0.000000e+00> : vector<8xf32>
    %38 = vector.multi_reduction <add>, %37, %cst_29 [1] : vector<8x1536xf32> to vector<8xf32>
    %39 = vector.shape_cast %38 : vector<8xf32> to vector<8x1xf32>
    %40 = vector.broadcast %39 : vector<8x1xf32> to vector<8x128xf32>
    %41 = arith.addf %36, %40 : vector<8x128xf32>
    %c8_30 = arith.constant 8 : index
    %c0_31 = arith.constant 0 : index
    %42 = vector.load %arg7[%c8_30, %c0_31] : memref<64x128xf32, #tpu.memory_space<vmem>>, vector<8x128xf32>
    tpu.vector_store %arg7[%c8_30, %c0_31], %41 {strides = array<i32>} : memref<64x128xf32, #tpu.memory_space<vmem>>, vector<8x128xf32>,
    %c2 = arith.constant 2 : index
    %c0_32 = arith.constant 0 : index
    %43 = vector.load %arg4[%c2, %c0_32] : memref<8x1536xbf16, #tpu.memory_space<vmem>>, vector<1x1536xbf16>
    %44 = arith.extf %43 : vector<1x1536xbf16> to vector<1x1536xf32>
    %c16 = arith.constant 16 : index
    %c0_33 = arith.constant 0 : index
    %45 = vector.load %arg5[%c16, %c0_33] : memref<64x1536xf32, #tpu.memory_space<vmem>>, vector<8x1536xf32>
    %46 = vector.broadcast %44 : vector<1x1536xf32> to vector<8x1536xf32>
    %47 = arith.mulf %45, %46 : vector<8x1536xf32>
    %c16_34 = arith.constant 16 : index
    %c0_35 = arith.constant 0 : index
    %48 = vector.load %arg6[%c16_34, %c0_35] : memref<64x128xf32, #tpu.memory_space<vmem>>, vector<8x128xf32>
    %cst_36 = arith.constant dense<0.000000e+00> : vector<8xf32>
    %49 = vector.multi_reduction <add>, %47, %cst_36 [1] : vector<8x1536xf32> to vector<8xf32>
    %50 = vector.shape_cast %49 : vector<8xf32> to vector<8x1xf32>
    %51 = vector.broadcast %50 : vector<8x1xf32> to vector<8x128xf32>
    %52 = arith.addf %48, %51 : vector<8x128xf32>
    %c16_37 = arith.constant 16 : index
    %c0_38 = arith.constant 0 : index
    %53 = vector.load %arg6[%c16_37, %c0_38] : memref<64x128xf32, #tpu.memory_space<vmem>>, vector<8x128xf32>
    tpu.vector_store %arg6[%c16_37, %c0_38], %52 {strides = array<i32>} : memref<64x128xf32, #tpu.memory_space<vmem>>, vector<8x128xf32>,
    %c16_39 = arith.constant 16 : index
    %c0_40 = arith.constant 0 : index
    %54 = vector.load %arg7[%c16_39, %c0_40] : memref<64x128xf32, #tpu.memory_space<vmem>>, vector<8x128xf32>
    %55 = arith.mulf %47, %47 : vector<8x1536xf32>
    %cst_41 = arith.constant dense<0.000000e+00> : vector<8xf32>
    %56 = vector.multi_reduction <add>, %55, %cst_41 [1] : vector<8x1536xf32> to vector<8xf32>
    %57 = vector.shape_cast %56 : vector<8xf32> to vector<8x1xf32>
    %58 = vector.broadcast %57 : vector<8x1xf32> to vector<8x128xf32>
    %59 = arith.addf %54, %58 : vector<8x128xf32>
    %c16_42 = arith.constant 16 : index
    %c0_43 = arith.constant 0 : index
    %60 = vector.load %arg7[%c16_42, %c0_43] : memref<64x128xf32, #tpu.memory_space<vmem>>, vector<8x128xf32>
    tpu.vector_store %arg7[%c16_42, %c0_43], %59 {strides = array<i32>} : memref<64x128xf32, #tpu.memory_space<vmem>>, vector<8x128xf32>,
    %c3 = arith.constant 3 : index
    %c0_44 = arith.constant 0 : index
    %61 = vector.load %arg4[%c3, %c0_44] : memref<8x1536xbf16, #tpu.memory_space<vmem>>, vector<1x1536xbf16>
    %62 = arith.extf %61 : vector<1x1536xbf16> to vector<1x1536xf32>
    %c24 = arith.constant 24 : index
    %c0_45 = arith.constant 0 : index
    %63 = vector.load %arg5[%c24, %c0_45] : memref<64x1536xf32, #tpu.memory_space<vmem>>, vector<8x1536xf32>
    %64 = vector.broadcast %62 : vector<1x1536xf32> to vector<8x1536xf32>
    %65 = arith.mulf %63, %64 : vector<8x1536xf32>
    %c24_46 = arith.constant 24 : index
    %c0_47 = arith.constant 0 : index
    %66 = vector.load %arg6[%c24_46, %c0_47] : memref<64x128xf32, #tpu.memory_space<vmem>>, vector<8x128xf32>
    %cst_48 = arith.constant dense<0.000000e+00> : vector<8xf32>
    %67 = vector.multi_reduction <add>, %65, %cst_48 [1] : vector<8x1536xf32> to vector<8xf32>
    %68 = vector.shape_cast %67 : vector<8xf32> to vector<8x1xf32>
    %69 = vector.broadcast %68 : vector<8x1xf32> to vector<8x128xf32>
    %70 = arith.addf %66, %69 : vector<8x128xf32>
    %c24_49 = arith.constant 24 : index
    %c0_50 = arith.constant 0 : index
    %71 = vector.load %arg6[%c24_49, %c0_50] : memref<64x128xf32, #tpu.memory_space<vmem>>, vector<8x128xf32>
    tpu.vector_store %arg6[%c24_49, %c0_50], %70 {strides = array<i32>} : memref<64x128xf32, #tpu.memory_space<vmem>>, vector<8x128xf32>,
    %c24_51 = arith.constant 24 : index
    %c0_52 = arith.constant 0 : index
    %72 = vector.load %arg7[%c24_51, %c0_52] : memref<64x128xf32, #tpu.memory_space<vmem>>, vector<8x128xf32>
    %73 = arith.mulf %65, %65 : vector<8x1536xf32>
    %cst_53 = arith.constant dense<0.000000e+00> : vector<8xf32>
    %74 = vector.multi_reduction <add>, %73, %cst_53 [1] : vector<8x1536xf32> to vector<8xf32>
    %75 = vector.shape_cast %74 : vector<8xf32> to vector<8x1xf32>
    %76 = vector.broadcast %75 : vector<8x1xf32> to vector<8x128xf32>
    %77 = arith.addf %72, %76 : vector<8x128xf32>
    %c24_54 = arith.constant 24 : index
    %c0_55 = arith.constant 0 : index
    %78 = vector.load %arg7[%c24_54, %c0_55] : memref<64x128xf32, #tpu.memory_space<vmem>>, vector<8x128xf32>
    tpu.vector_store %arg7[%c24_54, %c0_55], %77 {strides = array<i32>} : memref<64x128xf32, #tpu.memory_space<vmem>>, vector<8x128xf32>,
    %c4 = arith.constant 4 : index
    %c0_56 = arith.constant 0 : index
    %79 = vector.load %arg4[%c4, %c0_56] : memref<8x1536xbf16, #tpu.memory_space<vmem>>, vector<1x1536xbf16>
    %80 = arith.extf %79 : vector<1x1536xbf16> to vector<1x1536xf32>
    %c32 = arith.constant 32 : index
    %c0_57 = arith.constant 0 : index
    %81 = vector.load %arg5[%c32, %c0_57] : memref<64x1536xf32, #tpu.memory_space<vmem>>, vector<8x1536xf32>
    %82 = vector.broadcast %80 : vector<1x1536xf32> to vector<8x1536xf32>
    %83 = arith.mulf %81, %82 : vector<8x1536xf32>
    %c32_58 = arith.constant 32 : index
    %c0_59 = arith.constant 0 : index
    %84 = vector.load %arg6[%c32_58, %c0_59] : memref<64x128xf32, #tpu.memory_space<vmem>>, vector<8x128xf32>
    %cst_60 = arith.constant dense<0.000000e+00> : vector<8xf32>
    %85 = vector.multi_reduction <add>, %83, %cst_60 [1] : vector<8x1536xf32> to vector<8xf32>
    %86 = vector.shape_cast %85 : vector<8xf32> to vector<8x1xf32>
    %87 = vector.broadcast %86 : vector<8x1xf32> to vector<8x128xf32>
    %88 = arith.addf %84, %87 : vector<8x128xf32>
    %c32_61 = arith.constant 32 : index
    %c0_62 = arith.constant 0 : index
    %89 = vector.load %arg6[%c32_61, %c0_62] : memref<64x128xf32, #tpu.memory_space<vmem>>, vector<8x128xf32>
    tpu.vector_store %arg6[%c32_61, %c0_62], %88 {strides = array<i32>} : memref<64x128xf32, #tpu.memory_space<vmem>>, vector<8x128xf32>,
    %c32_63 = arith.constant 32 : index
    %c0_64 = arith.constant 0 : index
    %90 = vector.load %arg7[%c32_63, %c0_64] : memref<64x128xf32, #tpu.memory_space<vmem>>, vector<8x128xf32>
    %91 = arith.mulf %83, %83 : vector<8x1536xf32>
    %cst_65 = arith.constant dense<0.000000e+00> : vector<8xf32>
    %92 = vector.multi_reduction <add>, %91, %cst_65 [1] : vector<8x1536xf32> to vector<8xf32>
    %93 = vector.shape_cast %92 : vector<8xf32> to vector<8x1xf32>
    %94 = vector.broadcast %93 : vector<8x1xf32> to vector<8x128xf32>
    %95 = arith.addf %90, %94 : vector<8x128xf32>
    %c32_66 = arith.constant 32 : index
    %c0_67 = arith.constant 0 : index
    %96 = vector.load %arg7[%c32_66, %c0_67] : memref<64x128xf32, #tpu.memory_space<vmem>>, vector<8x128xf32>
    tpu.vector_store %arg7[%c32_66, %c0_67], %95 {strides = array<i32>} : memref<64x128xf32, #tpu.memory_space<vmem>>, vector<8x128xf32>,
    %c5 = arith.constant 5 : index
    %c0_68 = arith.constant 0 : index
    %97 = vector.load %arg4[%c5, %c0_68] : memref<8x1536xbf16, #tpu.memory_space<vmem>>, vector<1x1536xbf16>
    %98 = arith.extf %97 : vector<1x1536xbf16> to vector<1x1536xf32>
    %c40 = arith.constant 40 : index
    %c0_69 = arith.constant 0 : index
    %99 = vector.load %arg5[%c40, %c0_69] : memref<64x1536xf32, #tpu.memory_space<vmem>>, vector<8x1536xf32>
    %100 = vector.broadcast %98 : vector<1x1536xf32> to vector<8x1536xf32>
    %101 = arith.mulf %99, %100 : vector<8x1536xf32>
    %c40_70 = arith.constant 40 : index
    %c0_71 = arith.constant 0 : index
    %102 = vector.load %arg6[%c40_70, %c0_71] : memref<64x128xf32, #tpu.memory_space<vmem>>, vector<8x128xf32>
    %cst_72 = arith.constant dense<0.000000e+00> : vector<8xf32>
    %103 = vector.multi_reduction <add>, %101, %cst_72 [1] : vector<8x1536xf32> to vector<8xf32>
    %104 = vector.shape_cast %103 : vector<8xf32> to vector<8x1xf32>
    %105 = vector.broadcast %104 : vector<8x1xf32> to vector<8x128xf32>
    %106 = arith.addf %102, %105 : vector<8x128xf32>
    %c40_73 = arith.constant 40 : index
    %c0_74 = arith.constant 0 : index
    %107 = vector.load %arg6[%c40_73, %c0_74] : memref<64x128xf32, #tpu.memory_space<vmem>>, vector<8x128xf32>
    tpu.vector_store %arg6[%c40_73, %c0_74], %106 {strides = array<i32>} : memref<64x128xf32, #tpu.memory_space<vmem>>, vector<8x128xf32>,
    %c40_75 = arith.constant 40 : index
    %c0_76 = arith.constant 0 : index
    %108 = vector.load %arg7[%c40_75, %c0_76] : memref<64x128xf32, #tpu.memory_space<vmem>>, vector<8x128xf32>
    %109 = arith.mulf %101, %101 : vector<8x1536xf32>
    %cst_77 = arith.constant dense<0.000000e+00> : vector<8xf32>
    %110 = vector.multi_reduction <add>, %109, %cst_77 [1] : vector<8x1536xf32> to vector<8xf32>
    %111 = vector.shape_cast %110 : vector<8xf32> to vector<8x1xf32>
    %112 = vector.broadcast %111 : vector<8x1xf32> to vector<8x128xf32>
    %113 = arith.addf %108, %112 : vector<8x128xf32>
    %c40_78 = arith.constant 40 : index
    %c0_79 = arith.constant 0 : index
    %114 = vector.load %arg7[%c40_78, %c0_79] : memref<64x128xf32, #tpu.memory_space<vmem>>, vector<8x128xf32>
    tpu.vector_store %arg7[%c40_78, %c0_79], %113 {strides = array<i32>} : memref<64x128xf32, #tpu.memory_space<vmem>>, vector<8x128xf32>,
    %c6 = arith.constant 6 : index
    %c0_80 = arith.constant 0 : index
    %115 = vector.load %arg4[%c6, %c0_80] : memref<8x1536xbf16, #tpu.memory_space<vmem>>, vector<1x1536xbf16>
    %116 = arith.extf %115 : vector<1x1536xbf16> to vector<1x1536xf32>
    %c48 = arith.constant 48 : index
    %c0_81 = arith.constant 0 : index
    %117 = vector.load %arg5[%c48, %c0_81] : memref<64x1536xf32, #tpu.memory_space<vmem>>, vector<8x1536xf32>
    %118 = vector.broadcast %116 : vector<1x1536xf32> to vector<8x1536xf32>
    %119 = arith.mulf %117, %118 : vector<8x1536xf32>
    %c48_82 = arith.constant 48 : index
    %c0_83 = arith.constant 0 : index
    %120 = vector.load %arg6[%c48_82, %c0_83] : memref<64x128xf32, #tpu.memory_space<vmem>>, vector<8x128xf32>
    %cst_84 = arith.constant dense<0.000000e+00> : vector<8xf32>
    %121 = vector.multi_reduction <add>, %119, %cst_84 [1] : vector<8x1536xf32> to vector<8xf32>
    %122 = vector.shape_cast %121 : vector<8xf32> to vector<8x1xf32>
    %123 = vector.broadcast %122 : vector<8x1xf32> to vector<8x128xf32>
    %124 = arith.addf %120, %123 : vector<8x128xf32>
    %c48_85 = arith.constant 48 : index
    %c0_86 = arith.constant 0 : index
    %125 = vector.load %arg6[%c48_85, %c0_86] : memref<64x128xf32, #tpu.memory_space<vmem>>, vector<8x128xf32>
    tpu.vector_store %arg6[%c48_85, %c0_86], %124 {strides = array<i32>} : memref<64x128xf32, #tpu.memory_space<vmem>>, vector<8x128xf32>,
    %c48_87 = arith.constant 48 : index
    %c0_88 = arith.constant 0 : index
    %126 = vector.load %arg7[%c48_87, %c0_88] : memref<64x128xf32, #tpu.memory_space<vmem>>, vector<8x128xf32>
    %127 = arith.mulf %119, %119 : vector<8x1536xf32>
    %cst_89 = arith.constant dense<0.000000e+00> : vector<8xf32>
    %128 = vector.multi_reduction <add>, %127, %cst_89 [1] : vector<8x1536xf32> to vector<8xf32>
    %129 = vector.shape_cast %128 : vector<8xf32> to vector<8x1xf32>
    %130 = vector.broadcast %129 : vector<8x1xf32> to vector<8x128xf32>
    %131 = arith.addf %126, %130 : vector<8x128xf32>
    %c48_90 = arith.constant 48 : index
    %c0_91 = arith.constant 0 : index
    %132 = vector.load %arg7[%c48_90, %c0_91] : memref<64x128xf32, #tpu.memory_space<vmem>>, vector<8x128xf32>
    tpu.vector_store %arg7[%c48_90, %c0_91], %131 {strides = array<i32>} : memref<64x128xf32, #tpu.memory_space<vmem>>, vector<8x128xf32>,
    %c7 = arith.constant 7 : index
    %c0_92 = arith.constant 0 : index
    %133 = vector.load %arg4[%c7, %c0_92] : memref<8x1536xbf16, #tpu.memory_space<vmem>>, vector<1x1536xbf16>
    %134 = arith.extf %133 : vector<1x1536xbf16> to vector<1x1536xf32>
    %c56 = arith.constant 56 : index
    %c0_93 = arith.constant 0 : index
    %135 = vector.load %arg5[%c56, %c0_93] : memref<64x1536xf32, #tpu.memory_space<vmem>>, vector<8x1536xf32>
    %136 = vector.broadcast %134 : vector<1x1536xf32> to vector<8x1536xf32>
    %137 = arith.mulf %135, %136 : vector<8x1536xf32>
    %c56_94 = arith.constant 56 : index
    %c0_95 = arith.constant 0 : index
    %138 = vector.load %arg6[%c56_94, %c0_95] : memref<64x128xf32, #tpu.memory_space<vmem>>, vector<8x128xf32>
    %cst_96 = arith.constant dense<0.000000e+00> : vector<8xf32>
    %139 = vector.multi_reduction <add>, %137, %cst_96 [1] : vector<8x1536xf32> to vector<8xf32>
    %140 = vector.shape_cast %139 : vector<8xf32> to vector<8x1xf32>
    %141 = vector.broadcast %140 : vector<8x1xf32> to vector<8x128xf32>
    %142 = arith.addf %138, %141 : vector<8x128xf32>
    %c56_97 = arith.constant 56 : index
    %c0_98 = arith.constant 0 : index
    %143 = vector.load %arg6[%c56_97, %c0_98] : memref<64x128xf32, #tpu.memory_space<vmem>>, vector<8x128xf32>
    tpu.vector_store %arg6[%c56_97, %c0_98], %142 {strides = array<i32>} : memref<64x128xf32, #tpu.memory_space<vmem>>, vector<8x128xf32>,
    %c56_99 = arith.constant 56 : index
    %c0_100 = arith.constant 0 : index
    %144 = vector.load %arg7[%c56_99, %c0_100] : memref<64x128xf32, #tpu.memory_space<vmem>>, vector<8x128xf32>
    %145 = arith.mulf %137, %137 : vector<8x1536xf32>
    %cst_101 = arith.constant dense<0.000000e+00> : vector<8xf32>
    %146 = vector.multi_reduction <add>, %145, %cst_101 [1] : vector<8x1536xf32> to vector<8xf32>
    %147 = vector.shape_cast %146 : vector<8xf32> to vector<8x1xf32>
    %148 = vector.broadcast %147 : vector<8x1xf32> to vector<8x128xf32>
    %149 = arith.addf %144, %148 : vector<8x128xf32>
    %c56_102 = arith.constant 56 : index
    %c0_103 = arith.constant 0 : index
    %150 = vector.load %arg7[%c56_102, %c0_103] : memref<64x128xf32, #tpu.memory_space<vmem>>, vector<8x128xf32>
    tpu.vector_store %arg7[%c56_102, %c0_103], %149 {strides = array<i32>} : memref<64x128xf32, #tpu.memory_space<vmem>>, vector<8x128xf32>,
    return
  }
  func.func @transform_0(%arg0: i32, %arg1: i32) -> (i32, i32) {
    %c0_i32 = arith.constant 0 : i32
    %c0_i32_0 = arith.constant 0 : i32
    %c0_i32_1 = arith.constant 0 : i32
    return %c0_i32, %c0_i32_0 : i32, i32
  }
  func.func @transform_1(%arg0: i32, %arg1: i32) -> (i32, i32) {
    %c1_i32 = arith.constant 1 : i32
    %0 = arith.muli %arg1, %c1_i32 : i32
    %1 = arith.addi %0, %arg0 : i32
    %c0_i32 = arith.constant 0 : i32
    %c0_i32_0 = arith.constant 0 : i32
    return %c0_i32, %1 : i32, i32
  }
  func.func @transform_2(%arg0: i32, %arg1: i32) -> (i32, i32) {
    %c1_i32 = arith.constant 1 : i32
    %0 = arith.muli %arg1, %c1_i32 : i32
    %1 = arith.addi %0, %arg0 : i32
    %c0_i32 = arith.constant 0 : i32
    %c0_i32_0 = arith.constant 0 : i32
    return %c0_i32, %1 : i32, i32
  }
  func.func @transform_3(%arg0: i32, %arg1: i32) -> (i32, i32) {
    %c1_i32 = arith.constant 1 : i32
    %0 = arith.muli %arg1, %c1_i32 : i32
    %1 = arith.addi %0, %arg0 : i32
    %c0_i32 = arith.constant 0 : i32
    %c0_i32_0 = arith.constant 0 : i32
    return %c0_i32, %1 : i32, i32
  }
  func.func @transform_4(%arg0: i32, %arg1: i32) -> (i32, i32) {
    %c0_i32 = arith.constant 0 : i32
    %c0_i32_0 = arith.constant 0 : i32
    return %c0_i32, %arg0 : i32, i32
  }
  func.func @transform_5(%arg0: i32, %arg1: i32) -> (i32, i32) {
    %c0_i32 = arith.constant 0 : i32
    %c0_i32_0 = arith.constant 0 : i32
    return %c0_i32, %arg0 : i32, i32
  }
}

</mosaic_0001>

<bundles_post_ra>
// kernel: deconv3d_bn_relu.1
= control target key start
LH: loop header
LB: loop body
LE: loop exit
PB: predicated region body
PF: predicated region fallthrough
CT: control target
= control target key end

     0   :  { %v2027_v1 = vmov 0   ;;  %vm268_vm0 = vcmask 261120   ;;  %v845_v29 = vlaneseq  ;;  %s3332_s1 = inlined_call_operand.vmem [shape: bf16[32,1536], index: 1, kind: input, shape index: {}]   ;;  %s3333_s0 = inlined_call_operand.vmem [shape: bf16[64,32], index: 0, kind: input, shape index: {}]   ;;  %s3334_s2 = inlined_call_operand.vmem [shape: bf16[8,1536], index: 2, kind: input, shape index: {}]   ;;  %s3335_s3 = inlined_call_operand.vmem [shape: f32[64,1536], index: 3, kind: output, shape index: {0}]   ;;  %s3336_s4 = inlined_call_operand.vmem [shape: f32[64,128], index: 4, kind: output, shape index: {1}]   ;;  %s3337_s5 = inlined_call_operand.vmem [shape: f32[64,128], index: 5, kind: output, shape index: {2}]  }
   0x1   :  { %v1987_v0 = vld [vmem:[%s3332_s1 + $0x4] ss:$48 sps:$4 sm:$0xff]   ;;  %313 = vmatprep.mubr.bf16.mxu0 %v2027_v1  ;;  %386 = vmatprep.mubr.bf16.mxu1 %v2027_v1  ;;  %v1989_v2 = vld [vmem:[%s3332_s1] ss:$48 sps:$4 sm:$0xff]   ;;  %v1990_v3 = vld [vmem:[%s3332_s1 + $0xc] ss:$48 sps:$4 sm:$0xff]  }
   0x2   :  { %281 = vmatprep.subr.bf16.mxu0 %v1987_v0  ;;  %v1992_v4 = vld [vmem:[%s3332_s1 + $0x8] ss:$48 sps:$4 sm:$0xff]   ;;  %v1993_v5 = vld [vmem:[%s3332_s1 + $0x64] ss:$48 sps:$4 sm:$0xff]   ;;  %v1995_v6 = vld [vmem:[%s3332_s1 + $0x60] ss:$48 sps:$4 sm:$0xff]   ;;  %354 = vmatprep.subr.bf16.mxu1 %v1990_v3 }
   0x3   :  { %282 = vmatpush1.bf16.msra.mxu0 %v1989_v2  ;;  %v1996_v7 = vld [vmem:[%s3332_s1 + $0x6c] ss:$48 sps:$4 sm:$0xff]   ;;  %355 = vmatpush1.bf16.msra.mxu1 %v1992_v4  ;;  %v1998_v8 = vld [vmem:[%s3332_s1 + $0x68] ss:$48 sps:$4 sm:$0xff]   ;;  %v2087_v9 = vld [vmem:[%s3333_s0] sm:$0xff]   ;;  %v2198_v30 = vshrl.u32 %v845_v29, 7 }
   0x4   :  { %283 = vmatprep.subr.bf16.mxu0 %v1993_v5  ;;  %356 = vmatprep.subr.bf16.mxu1 %v1996_v7  ;;  %v2000_v10 = vld [vmem:[%s3332_s1 + $0x10] ss:$48 sps:$4 sm:$0xff]   ;;  %v2002_v11 = vld [vmem:[%s3332_s1 + $0x14] ss:$48 sps:$4 sm:$0xff]   ;;  %v2005_v12 = vld [vmem:[%s3332_s1 + $0x1c] ss:$48 sps:$4 sm:$0xff]  }
   0x5   :  { %v2003_v13 = vld [vmem:[%s3332_s1 + $0x18] ss:$48 sps:$4 sm:$0xff]   ;;  %v2008_v14 = vld [vmem:[%s3332_s1 + $0x70] ss:$48 sps:$4 sm:$0xff]   ;;  %v2010_v15 = vld [vmem:[%s3332_s1 + $0x74] ss:$48 sps:$4 sm:$0xff]  }
   0x6   :  { %v2011_v16 = vld [vmem:[%s3332_s1 + $0x78] ss:$48 sps:$4 sm:$0xff]   ;;  %v2013_v17 = vld [vmem:[%s3332_s1 + $0x7c] ss:$48 sps:$4 sm:$0xff]   ;;  %v2017_v19 = vld [vmem:[%s3332_s1 + $0x24] ss:$48 sps:$4 sm:$0xff]  }
   0x7   :  { %284 = vmatpush1.bf16.msra.mxu0 %v1995_v6  ;;  %357 = vmatpush1.bf16.msra.mxu1 %v1998_v8  ;;  %v2006_v18 = vld [vmem:[%s3333_s0 + $0x8] sm:$0xff]   ;;  %v2007_v21 = vld [vmem:[%s3333_s0 + $0x10] sm:$0xff]   ;;  %v2014_v22 = vld [vmem:[%s3333_s0 + $0x18] sm:$0xff]   ;;  %v2210_v35 = vsub.s32 0, %v2198_v30  ;;  %v2219_v43 = vsub.s32 1, %v2198_v30  ;;  %v2231_v51 = vsub.s32 2, %v2198_v30 }
   0x8   :  { %427 = vmatprep.subr.bf16.mxu0 %v2002_v11  ;;  %500 = vmatprep.subr.bf16.mxu1 %v2005_v12  ;;  %v2020_v20 = vld [vmem:[%s3332_s1 + $0x2c] ss:$48 sps:$4 sm:$0xff]   ;;  %v2015_v23 = vld [vmem:[%s3332_s1 + $0x20] ss:$48 sps:$4 sm:$0xff]   ;;  %v2023_v24 = vld [vmem:[%s3332_s1 + $0x84] ss:$48 sps:$4 sm:$0xff]  }
   0x9   :  { %v2018_v25 = vld [vmem:[%s3332_s1 + $0x28] ss:$48 sps:$4 sm:$0xff]   ;;  %v2026_v26 = vld [vmem:[%s3332_s1 + $0x8c] ss:$48 sps:$4 sm:$0xff]   ;;  %v2021_v27 = vld [vmem:[%s3332_s1 + $0x80] ss:$48 sps:$4 sm:$0xff]  }
   0xa   :  { %1961 = vmatmul.mubr.msk.bf16.vlgmr.msra.gmra.mrb[0].mxu0 %vm268_vm0, %v2087_v9  ;;  %1965 = vmatmul.mubr.msk.bf16.vlgmr.msra.gmra.mrb[0].mxu1 %vm268_vm0, %v2087_v9  ;;  %v2024_v28 = vld [vmem:[%s3332_s1 + $0x88] ss:$48 sps:$4 sm:$0xff]   ;;  %v815_v31 = vld [vmem:[%s3334_s2] sm:$0x11]  ;;  %v1083_v39 = vld [vmem:[%s3334_s2] sm:$0x22] }
   0xb   :  { %428 = vmatpush1.bf16.msra.mxu0 %v2000_v10  ;;  %323 = vmatprep.mubr.bf16.mxu0 %v2027_v1  ;;  %v949_v32 = vld [vmem:[%s3334_s2] sm:$0x11]  ;;  %v816_v33 = vld [vmem:[%s3334_s2 + $0x8] sm:$0x11]  ;;  %v821_v34 = vunpack.c.l.bf16 %v815_v31  ;;  %v822_v37 = vunpack.c.h.bf16 %v815_v31  ;;  %v1084_v44 = vld [vmem:[%s3334_s2 + $0x8] sm:$0x22]  ;;  %v1089_v49 = vunpack.c.l.bf16 %v1083_v39  ;;  %v1090_v50 = vunpack.c.h.bf16 %v1083_v39 }
   0xc   :  { %501 = vmatpush1.bf16.msra.mxu1 %v2003_v13  ;;  %396 = vmatprep.mubr.bf16.mxu1 %v2027_v1  ;;  %v950_v36 = vld [vmem:[%s3334_s2 + $0x8] sm:$0x11]  ;;  %v955_v38 = vunpack.c.l.bf16 %v949_v32  ;;  %v823_v40 = vunpack.c.l.bf16 %v816_v33  ;;  %v824_v41 = vunpack.c.h.bf16 %v816_v33  ;;  %v956_v42 = vunpack.c.h.bf16 %v949_v32  ;;  %v1217_v45 = vld [vmem:[%s3334_s2] sm:$0x22]  ;;  %v1218_v52 = vld [vmem:[%s3334_s2 + $0x8] sm:$0x22] }
   0xd   :  { %429 = vmatprep.subr.bf16.mxu0 %v2010_v15  ;;  %502 = vmatprep.subr.bf16.mxu1 %v2013_v17  ;;  %v2228_v46 = vrot.slane %v821_v34, %v2210_v35  ;;  %v957_v47 = vunpack.c.l.bf16 %v950_v36  ;;  %v958_v48 = vunpack.c.h.bf16 %v950_v36  ;;  %v2237_v53 = vrot.slane %v822_v37, %v2210_v35  ;;  %v1351_v61 = vld [vmem:[%s3334_s2] sm:$0x44]  ;;  %v1352_v2 = vld [vmem:[%s3334_s2 + $0x8] sm:$0x44]  ;;  %v817_v13 = vld [vmem:[%s3334_s2 + $0x10] sm:$0x11] }
   0xe   :  { %v1091_v54 = vunpack.c.l.bf16 %v1084_v44  ;;  %v1223_v55 = vunpack.c.l.bf16 %v1217_v45  ;;  %v2240_v56 = vsub.s32 3, %v2198_v30  ;;  %v2243_v57 = vrot.slane %v823_v40, %v2210_v35  ;;  %v1485_v3 = vld [vmem:[%s3334_s2] sm:$0x44]  ;;  %v1486_v12 = vld [vmem:[%s3334_s2 + $0x8] sm:$0x44] }
   0xf   :  { %430 = vmatpush1.bf16.msra.mxu0 %v2008_v14  ;;  %v2246_v58 = vrot.slane %v824_v41, %v2210_v35  ;;  %v2249_v59 = vrot.slane %v955_v38, %v2219_v43  ;;  %v2252_v60 = vrot.slane %v956_v42, %v2219_v43  ;;  %v2258_v62 = vrot.slane %v957_v47, %v2219_v43  ;;  %v951_v14 = vld [vmem:[%s3334_s2 + $0x10] sm:$0x11]  ;;  %v1085_v42 = vld [vmem:[%s3334_s2 + $0x10] sm:$0x22] }
  0x10   :  { %503 = vmatpush1.bf16.msra.mxu1 %v2011_v16  ;;  %573 = vmatprep.subr.bf16.mxu0 %v2017_v19  ;;  %v1092_v63 = vunpack.c.h.bf16 %v1084_v44  ;;  %v1224_v0 = vunpack.c.h.bf16 %v1217_v45  ;;  %v2267_v4 = vrot.slane %v958_v48, %v2219_v43  ;;  %v2270_v5 = vrot.slane %v1089_v49, %v2231_v51  ;;  %v1619_v45 = vld [vmem:[%s3334_s2] sm:$0x88] }
  0x11   :  { %646 = vmatprep.subr.bf16.mxu1 %v2020_v20  ;;  %v2273_v6 = vrot.slane %v1090_v50, %v2231_v51  ;;  %v1226_v7 = vunpack.c.h.bf16 %v1218_v52  ;;  %v2276_v8 = vrot.slane %v1091_v54, %v2231_v51  ;;  %v1357_v10 = vunpack.c.l.bf16 %v1351_v61 }
  0x12   :  { %1962 = vmatmul.mubr.msk.bf16.gmra.mrb[4].mxu0 %vm268_vm0, %v2006_v18  ;;  %1966 = vmatmul.mubr.msk.bf16.gmra.mrb[4].mxu1 %vm268_vm0, %v2006_v18  ;;  %v2282_v11 = vsub.s32 4, %v2198_v30  ;;  %v1358_v15 = vunpack.c.h.bf16 %v1351_v61  ;;  %v1359_v16 = vunpack.c.l.bf16 %v1352_v2  ;;  %v1491_v17 = vunpack.c.l.bf16 %v1485_v3 }
  0x13   :  { %333 = vmatprep.mubr.bf16.mxu0 %v2027_v1  ;;  %406 = vmatprep.mubr.bf16.mxu1 %v2027_v1  ;;  %v2297_v19 = vrot.slane %v1092_v63, %v2231_v51  ;;  %v2300_v20 = vrot.slane %v1224_v0, %v2240_v56  ;;  %v825_v29 = vunpack.c.l.bf16 %v817_v13  ;;  %v826_v31 = vunpack.c.h.bf16 %v817_v13  ;;  %v1219_v0 = vld [vmem:[%s3334_s2 + $0x10] sm:$0x22] }
  0x14   :  { %v959_v32 = vunpack.c.l.bf16 %v951_v14  ;;  %v960_v33 = vunpack.c.h.bf16 %v951_v14  ;;  %v2315_v34 = vrot.slane %v1357_v10, %v2282_v11  ;;  %v2318_v36 = vrot.slane %v1358_v15, %v2282_v11 }
  0x15   :  { %v2321_v37 = vrot.slane %v1359_v16, %v2282_v11  ;;  %v2348_v54 = vrot.slane %v825_v29, %v2210_v35  ;;  %v1626_v10 = vunpack.c.h.bf16 %v1619_v45 }
  0x16   :  { %v2354_v61 = vrot.slane %v959_v32, %v2219_v43  ;;  %v2357_v63 = vrot.slane %v960_v33, %v2219_v43 }
  0x1a   :  { %1963 = vmatmul.mubr.msk.bf16.gmra.mrb[8].mxu0 %vm268_vm0, %v2007_v21  ;;  %1967 = vmatmul.mubr.msk.bf16.gmra.mrb[8].mxu1 %vm268_vm0, %v2007_v21 }
  0x1b   :  { %343 = vmatprep.mubr.bf16.mxu0 %v2027_v1  ;;  %416 = vmatprep.mubr.bf16.mxu1 %v2027_v1 }
  0x22   :  { %1964 = vmatmul.mubr.msk.bf16.gmra.mrb[12].mxu0 %vm268_vm0, %v2014_v22  ;;  %1968 = vmatmul.mubr.msk.bf16.gmra.mrb[12].mxu1 %vm268_vm0, %v2014_v22 }
  0x23   :  { %459 = vmatprep.mubr.bf16.mxu0 %v2027_v1  ;;  %532 = vmatprep.mubr.bf16.mxu1 %v2027_v1 }
  0x2a   :  { %1969 = vmatmul.mubr.msk.bf16.vlgmr.msra.gmra.mrb[16].mxu0 %vm268_vm0, %v2087_v9  ;;  %1973 = vmatmul.mubr.msk.bf16.vlgmr.msra.gmra.mrb[16].mxu1 %vm268_vm0, %v2087_v9 }
  0x2b   :  { %574 = vmatpush1.bf16.msra.mxu0 %v2015_v23  ;;  %469 = vmatprep.mubr.bf16.mxu0 %v2027_v1  ;;  %v818_v23 = vld [vmem:[%s3334_s2 + $0x18] sm:$0x11] }
  0x2c   :  { %575 = vmatprep.subr.bf16.mxu0 %v2023_v24  ;;  %647 = vmatpush1.bf16.msra.mxu1 %v2018_v25  ;;  %v952_v24 = vld [vmem:[%s3334_s2 + $0x18] sm:$0x11]  ;;  %v2312_v25 = vrot.slane %v1226_v7, %v2240_v56  ;;  %v827_v39 = vunpack.c.l.bf16 %v818_v23  ;;  %v828_v40 = vunpack.c.h.bf16 %v818_v23  ;;  %v1625_v7 = vunpack.c.l.bf16 %v1619_v45 }
  0x2d   :  { %542 = vmatprep.mubr.bf16.mxu1 %v2027_v1  ;;  %648 = vmatprep.subr.bf16.mxu1 %v2026_v26  ;;  %v1360_v26 = vunpack.c.h.bf16 %v1352_v2  ;;  %v961_v41 = vunpack.c.l.bf16 %v952_v24  ;;  %v962_v47 = vunpack.c.h.bf16 %v952_v24  ;;  %v1093_v2 = vunpack.c.l.bf16 %v1085_v42  ;;  %v1353_v24 = vld [vmem:[%s3334_s2 + $0x10] sm:$0x44] }
  0x2e   :  { %v2372_v13 = vrot.slane %v827_v39, %v2210_v35  ;;  %v2375_v14 = vrot.slane %v828_v40, %v2210_v35  ;;  %v1227_v23 = vunpack.c.l.bf16 %v1219_v0  ;;  %v1362_v45 = vunpack.c.h.bf16 %v1353_v24 }
  0x2f   :  { %576 = vmatpush1.bf16.msra.mxu0 %v2021_v27  ;;  %v1493_v27 = vunpack.c.l.bf16 %v1486_v12  ;;  %v2336_v48 = vrot.slane %v1360_v26, %v2282_v11  ;;  %v2378_v15 = vrot.slane %v961_v41, %v2219_v43  ;;  %v1354_v26 = vld [vmem:[%s3334_s2 + $0x18] sm:$0x44]  ;;  %v2390_v33 = vrot.slane %v1093_v2, %v2231_v51 }
  0x30   :  { %649 = vmatpush1.bf16.msra.mxu1 %v2024_v28  ;;  %v1494_v28 = vunpack.c.h.bf16 %v1486_v12  ;;  %v2369_v12 = vsub.s32 6, %v2198_v30 }
  0x31   :  { %3342 = vst [vmem:[#allocation4_spill] sm:$0xff] %v2390_v33 }
  0x32   :  { %1970 = vmatmul.mubr.msk.bf16.gmra.mrb[20].mxu0 %vm268_vm0, %v2006_v18  ;;  %1974 = vmatmul.mubr.msk.bf16.gmra.mrb[20].mxu1 %vm268_vm0, %v2006_v18  ;;  %v2393_v40 = vrot.slane %v1625_v7, %v2369_v12  ;;  %v2396_v41 = vrot.slane %v1626_v10, %v2369_v12  ;;  %v1364_v7 = vunpack.c.h.bf16 %v1354_v26 }
  0x33   :  { %479 = vmatprep.mubr.bf16.mxu0 %v2027_v1  ;;  %552 = vmatprep.mubr.bf16.mxu1 %v2027_v1 }
  0x34   :  { %3343 = vst [vmem:[#allocation5_spill] sm:$0xff] %v2393_v40  ;;  %3344 = vst [vmem:[#allocation6_spill] sm:$0xff] %v2396_v41  ;;  %v2450_v41 = vrot.slane %v1362_v45, %v2282_v11  ;;  %v2462_v40 = vrot.slane %v1364_v7, %v2282_v11 }
  0x36   :  { %3356 = vst [vmem:[#allocation18_spill] sm:$0xff] %v2450_v41 }
  0x3a   :  { %1971 = vmatmul.mubr.msk.bf16.gmra.mrb[24].mxu0 %vm268_vm0, %v2007_v21  ;;  %1975 = vmatmul.mubr.msk.bf16.gmra.mrb[24].mxu1 %vm268_vm0, %v2007_v21 }
  0x3b   :  { %489 = vmatprep.mubr.bf16.mxu0 %v2027_v1  ;;  %562 = vmatprep.mubr.bf16.mxu1 %v2027_v1 }
  0x42   :  { %1972 = vmatmul.mubr.msk.bf16.gmra.mrb[28].mxu0 %vm268_vm0, %v2014_v22  ;;  %1976 = vmatmul.mubr.msk.bf16.gmra.mrb[28].mxu1 %vm268_vm0, %v2014_v22 }
  0x43   :  { %605 = vmatprep.mubr.bf16.mxu0 %v2027_v1  ;;  %678 = vmatprep.mubr.bf16.mxu1 %v2027_v1 }
  0x4a   :  { %1977 = vmatmul.mubr.msk.bf16.vlgmr.msra.gmra.mrb[32].mxu0 %vm268_vm0, %v2087_v9  ;;  %1981 = vmatmul.mubr.msk.bf16.vlgmr.msra.gmra.mrb[32].mxu1 %vm268_vm0, %v2087_v9  ;;  %v2279_v9 = vrot.slane %v1223_v55, %v2240_v56  ;;  %v2351_v55 = vrot.slane %v826_v31, %v2210_v35  ;;  %v1228_v31 = vunpack.c.h.bf16 %v1219_v0 }
  0x4b   :  { %615 = vmatprep.mubr.bf16.mxu0 %v2027_v1  ;;  %688 = vmatprep.mubr.bf16.mxu1 %v2027_v1 }
  0x52   :  { %1978 = vmatmul.mubr.msk.bf16.gmra.mrb[36].mxu0 %vm268_vm0, %v2006_v18  ;;  %1982 = vmatmul.mubr.msk.bf16.gmra.mrb[36].mxu1 %vm268_vm0, %v2006_v18  ;;  %v2294_v18 = vsub.s32 5, %v2198_v30 }
  0x53   :  { %625 = vmatprep.mubr.bf16.mxu0 %v2027_v1  ;;  %698 = vmatprep.mubr.bf16.mxu1 %v2027_v1 }
  0x54   :  { %v2324_v38 = vrot.slane %v1491_v17, %v2294_v18  ;;  %v2339_v49 = vrot.slane %v1493_v27, %v2294_v18  ;;  %v2342_v50 = vrot.slane %v1494_v28, %v2294_v18  ;;  %v2381_v17 = vrot.slane %v962_v47, %v2219_v43 }
  0x55   :  { %v1363_v47 = vunpack.c.l.bf16 %v1354_v26 }
  0x56   :  { %3340 = vst [vmem:[#allocation2_spill] sm:$0xff] %v2342_v50  ;;  %3341 = vst [vmem:[#allocation3_spill] sm:$0xff] %v2381_v17  ;;  %v2423_v50 = vrot.slane %v1228_v31, %v2240_v56  ;;  %v2441_v31 = vsub.s32 7, %v2198_v30  ;;  %v954_v30 = vld [vmem:[%s3334_s2 + $0x28] sm:$0x11] }
  0x57   :  { %v965_v17 = vunpack.c.l.bf16 %v954_v30 }
  0x58   :  { %3351 = vst [vmem:[#allocation13_spill] sm:$0xff] %v2423_v50  ;;  %3354 = vst [vmem:[#allocation16_spill] sm:$0xff] %v2441_v31 }
  0x5a   :  { %1979 = vmatmul.mubr.msk.bf16.gmra.mrb[40].mxu0 %vm268_vm0, %v2007_v21  ;;  %1983 = vmatmul.mubr.msk.bf16.gmra.mrb[40].mxu1 %vm268_vm0, %v2007_v21 }
  0x5b   :  { %635 = vmatprep.mubr.bf16.mxu0 %v2027_v1  ;;  %708 = vmatprep.mubr.bf16.mxu1 %v2027_v1  ;;  %v1225_v1 = vunpack.c.l.bf16 %v1218_v52  ;;  %v1620_v52 = vld [vmem:[%s3334_s2 + $0x8] sm:$0x88] }
  0x5c   :  { %v1627_v16 = vunpack.c.l.bf16 %v1620_v52  ;;  %v1628_v27 = vunpack.c.h.bf16 %v1620_v52  ;;  %v1487_v52 = vld [vmem:[%s3334_s2 + $0x10] sm:$0x44] }
  0x5d   :  { %v2303_v21 = vrot.slane %v1225_v1, %v2240_v56  ;;  %v1086_v1 = vld [vmem:[%s3334_s2 + $0x18] sm:$0x22] }
  0x5e   :  { %v1095_v28 = vunpack.c.l.bf16 %v1086_v1  ;;  %v1096_v29 = vunpack.c.h.bf16 %v1086_v1  ;;  %v2402_v0 = vrot.slane %v1627_v16, %v2369_v12  ;;  %v1753_v1 = vld [vmem:[%s3334_s2] sm:$0x88]  ;;  %v2414_v10 = vrot.slane %v1628_v27, %v2369_v12  ;;  %v1488_v27 = vld [vmem:[%s3334_s2 + $0x18] sm:$0x44] }
  0x60   :  { %3345 = vst [vmem:[#allocation7_spill] sm:$0xff] %v2402_v0  ;;  %3348 = vst [vmem:[#allocation10_spill] sm:$0xff] %v2414_v10  ;;  %v2420_v16 = vrot.slane %v1096_v29, %v2231_v51  ;;  %v1759_v29 = vunpack.c.l.bf16 %v1753_v1 }
  0x62   :  { %1980 = vmatmul.mubr.msk.bf16.gmra.mrb[44].mxu0 %vm268_vm0, %v2014_v22  ;;  %1984 = vmatmul.mubr.msk.bf16.gmra.mrb[44].mxu1 %vm268_vm0, %v2014_v22  ;;  %v1492_v22 = vunpack.c.h.bf16 %v1485_v3  ;;  %v1220_v3 = vld [vmem:[%s3334_s2 + $0x18] sm:$0x22]  ;;  %3350 = vst [vmem:[#allocation12_spill] sm:$0xff] %v2420_v16 }
  0x63   :  { %v1229_v32 = vunpack.c.l.bf16 %v1220_v3  ;;  %v1230_v39 = vunpack.c.h.bf16 %v1220_v3  ;;  %v2411_v3 = vrot.slane %v1227_v23, %v2240_v56  ;;  %v819_v23 = vld [vmem:[%s3334_s2 + $0x20] sm:$0x11] }
  0x64   :  { %v2330_v44 = vrot.slane %v1492_v22, %v2294_v18  ;;  %v1094_v22 = vunpack.c.h.bf16 %v1085_v42  ;;  %v1361_v42 = vunpack.c.l.bf16 %v1353_v24  ;;  %v2417_v24 = vrot.slane %v1095_v28, %v2231_v51 }
  0x65   :  { %3347 = vst [vmem:[#allocation9_spill] sm:$0xff] %v2411_v3  ;;  %v2426_v0 = vrot.slane %v1229_v32, %v2240_v56  ;;  %v2435_v26 = vrot.slane %v1230_v39, %v2240_v56  ;;  %v1495_v28 = vunpack.c.l.bf16 %v1487_v52  ;;  %v953_v32 = vld [vmem:[%s3334_s2 + $0x20] sm:$0x11]  ;;  %v2453_v39 = vrot.slane %v1363_v47, %v2282_v11 }
  0x66   :  { %v2408_v2 = vrot.slane %v1094_v22, %v2231_v51  ;;  %3349 = vst [vmem:[#allocation11_spill] sm:$0xff] %v2417_v24  ;;  %v1754_v22 = vld [vmem:[%s3334_s2 + $0x8] sm:$0x88]  ;;  %v2447_v10 = vrot.slane %v1361_v42, %v2282_v11  ;;  %v1496_v42 = vunpack.c.h.bf16 %v1487_v52  ;;  %v829_v45 = vunpack.c.l.bf16 %v819_v23  ;;  %v2473_v52 = vld [vmem:[%s3334_s2 + $0x10] sm:$0x88] }
  0x67   :  { %3352 = vst [vmem:[#allocation14_spill] sm:$0xff] %v2426_v0  ;;  %3353 = vst [vmem:[#allocation15_spill] sm:$0xff] %v2435_v26  ;;  %v1760_v26 = vunpack.c.h.bf16 %v1753_v1  ;;  %v820_v0 = vld [vmem:[%s3334_s2 + $0x28] sm:$0x11]  ;;  %v1762_v50 = vunpack.c.h.bf16 %v1754_v22  ;;  %v830_v41 = vunpack.c.h.bf16 %v819_v23  ;;  %v1497_v3 = vunpack.c.l.bf16 %v1488_v27 }
  0x68   :  { %3346 = vst [vmem:[#allocation8_spill] sm:$0xff] %v2408_v2  ;;  %3355 = vst [vmem:[#allocation17_spill] sm:$0xff] %v2447_v10  ;;  %v1761_v10 = vunpack.c.l.bf16 %v1754_v22  ;;  %v1498_v47 = vunpack.c.h.bf16 %v1488_v27  ;;  %v964_v1 = vunpack.c.h.bf16 %v953_v32  ;;  %v2465_v16 = vrot.slane %v1495_v28, %v2294_v18 }
  0x69   :  { %3357 = vst [vmem:[#allocation19_spill] sm:$0xff] %v2453_v39  ;;  %v963_v39 = vunpack.c.l.bf16 %v953_v32  ;;  %v2468_v24 = vrot.slane %v1759_v29, %v2441_v31  ;;  %v831_v2 = vunpack.c.l.bf16 %v820_v0  ;;  %v832_v33 = vunpack.c.h.bf16 %v820_v0 }
  0x6a   :  { %v2476_v7 = vrot.slane %v1760_v26, %v2441_v31  ;;  %v966_v22 = vunpack.c.h.bf16 %v954_v30  ;;  %v2479_v23 = vrot.slane %v1496_v42, %v2294_v18  ;;  %v2482_v27 = vrot.slane %v1761_v10, %v2441_v31 }
  0x6b   :  { %v2485_v28 = vrot.slane %v1762_v50, %v2441_v31  ;;  %v2488_v29 = vrot.slane %v829_v45, %v2210_v35  ;;  %v2491_v32 = vrot.slane %v830_v41, %v2210_v35  ;;  %v2494_v26 = vrot.slane %v1497_v3, %v2294_v18 }
  0x6c   :  { %v2497_v30 = vrot.slane %v1498_v47, %v2294_v18  ;;  %v2504_v42 = vrot.slane %v963_v39, %v2219_v43  ;;  %v2507_v45 = vrot.slane %v964_v1, %v2219_v43  ;;  %v1629_v41 = vunpack.c.l.bf16 %v2473_v52 }
  0x6d   :  { %3358 = vst [vmem:[#allocation20_spill] sm:$0xff] %v2485_v28  ;;  %3359 = vst [vmem:[#allocation21_spill] sm:$0xff] %v2491_v32  ;;  %v2514_v28 = vrot.slane %v831_v2, %v2210_v35  ;;  %v2517_v32 = vrot.slane %v832_v33, %v2210_v35  ;;  %v2521_v39 = vrot.slane %v965_v17, %v2219_v43 }
  0x6e   :  { %3360 = vst [vmem:[#allocation22_spill] sm:$0xff] %v2504_v42  ;;  %3361 = vst [vmem:[#allocation23_spill] sm:$0xff] %v2507_v45  ;;  %v2531_v35 = vrot.slane %v966_v22, %v2219_v43 }
  0x6f   :  { %3362 = vst [vmem:[#allocation24_spill] sm:$0xff] %v2514_v28  ;;  %3363 = vst [vmem:[#allocation25_spill] sm:$0xff] %v2517_v32 }
  0x70   :  { %3364 = vst [vmem:[#allocation26_spill] sm:$0xff] %v2521_v39  ;;  %3365 = vst [vmem:[#allocation27_spill] sm:$0xff] %v2531_v35  ;;  %v2549_v35 = vld [vmem:[%s3334_s2 + $0x20] sm:$0x22] }
  0xdd   :  { %v315_v0 = vpop.f32.mrb[0].mxu0  ;;  %v388_v47 = vpop.f32.mrb[0].mxu1 }
  0xde   :  { %719 = vst [vmem:[%s3335_s3] sm:$0xff] %v315_v0  ;;  %v317_v10 = vpop.f32.mrb[1].mxu0  ;;  %v893_v50 = vmul.f32 %v2228_v46, %v315_v0  ;;  %721 = vst [vmem:[%s3335_s3 + $0x10] sm:$0xff] %v388_v47  ;;  %v390_v0 = vpop.f32.mrb[1].mxu1  ;;  %v895_v2 = vmul.f32 %v2243_v57, %v388_v47 }
  0xdf   :  { %720 = vst [vmem:[%s3335_s3 + $0x8] sm:$0xff] %v317_v10  ;;  %v319_v3 = vpop.f32.mrb[2].mxu0  ;;  %v894_v46 = vmul.f32 %v2237_v53, %v317_v10  ;;  %722 = vst [vmem:[%s3335_s3 + $0x18] sm:$0xff] %v390_v0  ;;  %v392_v17 = vpop.f32.mrb[2].mxu1  ;;  %v896_v10 = vmul.f32 %v2246_v58, %v390_v0 }
  0xe0   :  { %731 = vst [vmem:[%s3335_s3 + $0x60] sm:$0xff] %v319_v3  ;;  %v321_v1 = vpop.f32.mrb[3].mxu0  ;;  %v1027_v53 = vmul.f32 %v2249_v59, %v319_v3  ;;  %v922_v33 = vmul.f32 %v893_v50, %v893_v50  ;;  %733 = vst [vmem:[%s3335_s3 + $0x70] sm:$0xff] %v392_v17  ;;  %v394_v43 = vpop.f32.mrb[3].mxu1  ;;  %v1029_v59 = vmul.f32 %v2258_v62, %v392_v17  ;;  %v2559_v62 = vld [vmem:[%s3334_s2 + $0x18] sm:$0x88] }
  0xe1   :  { %732 = vst [vmem:[%s3335_s3 + $0x68] sm:$0xff] %v321_v1  ;;  %v906_v39 = vadd.f32 %v894_v46, %v893_v50  ;;  %v1028_v57 = vmul.f32 %v2252_v60, %v321_v1  ;;  %v923_v47 = vmul.f32 %v894_v46, %v894_v46  ;;  %v924_v22 = vmul.f32 %v895_v2, %v895_v2 }
  0xe2   :  { %v1056_v3 = vmul.f32 %v1027_v53, %v1027_v53  ;;  %734 = vst [vmem:[%s3335_s3 + $0x78] sm:$0xff] %v394_v43  ;;  %v1030_v50 = vmul.f32 %v2267_v4, %v394_v43  ;;  %v2562_v1 = vrot.slane %v1629_v41, %v2369_v12  ;;  %v925_v0 = vmul.f32 %v896_v10, %v896_v10 }
  0xe3   :  { %v907_v60 = vadd.f32 %v906_v39, %v895_v2  ;;  %v1040_v46 = vadd.f32 %v1028_v57, %v1027_v53  ;;  %v934_v17 = vadd.f32 %v923_v47, %v922_v33  ;;  %v1057_v45 = vmul.f32 %v1028_v57, %v1028_v57 }
  0xe4   :  { %v1058_v58 = vmul.f32 %v1029_v59, %v1029_v59  ;;  %v1097_v39 = vunpack.c.l.bf16 %v2549_v35  ;;  %v1098_v4 = vunpack.c.h.bf16 %v2549_v35  ;;  %v1490_v35 = vld [vmem:[%s3334_s2 + $0x28] sm:$0x44] }
  0xe5   :  { %v325_v32 = vpop.f32.mrb[4].mxu0  ;;  %v2564_v42 = vadd.f32 %v907_v60, %v896_v10  ;;  %v1041_v28 = vadd.f32 %v1040_v46, %v1029_v59  ;;  %v935_v53 = vadd.f32 %v934_v17, %v924_v22  ;;  %v1068_v41 = vadd.f32 %v1057_v45, %v1056_v3  ;;  %v398_v57 = vpop.f32.mrb[4].mxu1 }
  0xe6   :  { %743 = vst [vmem:[%s3335_s3 + $0xc0] sm:$0xff] %v325_v32  ;;  %v327_v2 = vpop.f32.mrb[5].mxu0  ;;  %v1161_v43 = vmul.f32 %v2270_v5, %v325_v32  ;;  %v1059_v59 = vmul.f32 %v1030_v50, %v1030_v50  ;;  %745 = vst [vmem:[%s3335_s3 + $0xd0] sm:$0xff] %v398_v57  ;;  %v400_v32 = vpop.f32.mrb[5].mxu1 }
  0xe7   :  { %744 = vst [vmem:[%s3335_s3 + $0xc8] sm:$0xff] %v327_v2  ;;  %v329_v10 = vpop.f32.mrb[6].mxu0  ;;  %v2576_v47 = vadd.f32 %v1041_v28, %v1030_v50  ;;  %v1162_v60 = vmul.f32 %v2273_v6, %v327_v2  ;;  %v2586_v45 = vadd.f32 %v935_v53, %v925_v0  ;;  %v1069_v22 = vadd.f32 %v1068_v41, %v1058_v58  ;;  %v402_v6 = vpop.f32.mrb[6].mxu1 }
  0xe8   :  { %755 = vst [vmem:[%s3335_s3 + $0x120] sm:$0xff] %v329_v10  ;;  %v331_v5 = vpop.f32.mrb[7].mxu0  ;;  %v1163_v28 = vmul.f32 %v2276_v8, %v398_v57  ;;  %v1190_v3 = vmul.f32 %v1161_v43, %v1161_v43  ;;  %746 = vst [vmem:[%s3335_s3 + $0xd8] sm:$0xff] %v400_v32  ;;  %v1164_v50 = vmul.f32 %v2297_v19, %v400_v32  ;;  %v404_v8 = vpop.f32.mrb[7].mxu1 }
  0xe9   :  { %756 = vst [vmem:[%s3335_s3 + $0x128] sm:$0xff] %v331_v5  ;;  %v1174_v17 = vadd.f32 %v1162_v60, %v1161_v43  ;;  %v1191_v2 = vmul.f32 %v1162_v60, %v1162_v60  ;;  %v1295_v0 = vmul.f32 %v2279_v9, %v329_v10  ;;  %757 = vst [vmem:[%s3335_s3 + $0x130] sm:$0xff] %v402_v6  ;;  %v1221_v9 = vld [vmem:[%s3334_s2 + $0x20] sm:$0x22] }
  0xea   :  { %v2600_v58 = vadd.f32 %v1069_v22, %v1059_v59  ;;  %v1192_v53 = vmul.f32 %v1163_v28, %v1163_v28  ;;  %v1296_v41 = vmul.f32 %v2300_v20, %v331_v5  ;;  %v1297_v57 = vmul.f32 %v2303_v21, %v402_v6  ;;  %758 = vst [vmem:[%s3335_s3 + $0x138] sm:$0xff] %v404_v8  ;;  %v1088_v59 = vld [vmem:[%s3334_s2 + $0x28] sm:$0x22] }
  0xeb   :  { %v1175_v19 = vadd.f32 %v1174_v17, %v1163_v28  ;;  %v1193_v43 = vmul.f32 %v1164_v50, %v1164_v50  ;;  %v1202_v60 = vadd.f32 %v1191_v2, %v1190_v3  ;;  %v1298_v10 = vmul.f32 %v2312_v25, %v404_v8  ;;  %v1222_v20 = vld [vmem:[%s3334_s2 + $0x28] sm:$0x22] }
  0xec   :  { %v1308_v21 = vadd.f32 %v1296_v41, %v1295_v0  ;;  %v1324_v5 = vmul.f32 %v1295_v0, %v1295_v0  ;;  %v1325_v32 = vmul.f32 %v1296_v41, %v1296_v41  ;;  %v1326_v22 = vmul.f32 %v1297_v57, %v1297_v57 }
  0xed   :  { %v335_v28 = vpop.f32.mrb[8].mxu0  ;;  %v2618_v3 = vrot.slane %v1097_v39, %v2231_v51  ;;  %v2620_v6 = vadd.f32 %v1175_v19, %v1164_v50  ;;  %v1203_v17 = vadd.f32 %v1202_v60, %v1192_v53  ;;  %v3366_v25 = vunpack.c.h.bf16 %v2473_v52  ;;  %v1355_v39 = vld [vmem:[%s3334_s2 + $0x20] sm:$0x44]  ;;  %v408_v50 = vpop.f32.mrb[8].mxu1 }
  0xee   :  { %767 = vst [vmem:[%s3335_s3 + $0x180] sm:$0xff] %v335_v28  ;;  %v337_v8 = vpop.f32.mrb[9].mxu0  ;;  %v1231_v0 = vunpack.c.l.bf16 %v1221_v9  ;;  %v1232_v41 = vunpack.c.h.bf16 %v1221_v9  ;;  %v1309_v46 = vadd.f32 %v1308_v21, %v1297_v57  ;;  %v1336_v33 = vadd.f32 %v1325_v32, %v1324_v5  ;;  %v1489_v57 = vld [vmem:[%s3334_s2 + $0x20] sm:$0x44]  ;;  %769 = vst [vmem:[%s3335_s3 + $0x190] sm:$0xff] %v408_v50  ;;  %v410_v21 = vpop.f32.mrb[9].mxu1 }
  0xef   :  { %v2625_v2 = vrot.slane %v3366_v25, %v2369_v12  ;;  %768 = vst [vmem:[%s3335_s3 + $0x188] sm:$0xff] %v337_v8  ;;  %v339_v52 = vpop.f32.mrb[10].mxu0  ;;  %v1099_v53 = vunpack.c.l.bf16 %v1088_v59  ;;  %v1100_v19 = vunpack.c.h.bf16 %v1088_v59  ;;  %v2636_v60 = vadd.f32 %v1203_v17, %v1193_v43  ;;  %v1356_v17 = vld [vmem:[%s3334_s2 + $0x28] sm:$0x44]  ;;  %770 = vst [vmem:[%s3335_s3 + $0x198] sm:$0xff] %v410_v21  ;;  %v412_v25 = vpop.f32.mrb[10].mxu1 }
  0xf0   :  { %v1233_v28 = vunpack.c.l.bf16 %v1222_v20  ;;  %779 = vst [vmem:[%s3335_s3 + $0x1e0] sm:$0xff] %v339_v52  ;;  %v341_v9 = vpop.f32.mrb[11].mxu0  ;;  %v1234_v5 = vunpack.c.h.bf16 %v1222_v20  ;;  %v2647_v32 = vadd.f32 %v1309_v46, %v1298_v10  ;;  %v1327_v43 = vmul.f32 %v1298_v10, %v1298_v10  ;;  %781 = vst [vmem:[%s3335_s3 + $0x1f0] sm:$0xff] %v412_v25  ;;  %v414_v8 = vpop.f32.mrb[11].mxu1 }
  0xf1   :  { %v1337_v59 = vadd.f32 %v1336_v33, %v1326_v22  ;;  %780 = vst [vmem:[%s3335_s3 + $0x1e8] sm:$0xff] %v341_v9  ;;  %v2661_v46 = vrot.slane %v1098_v4, %v2231_v51  ;;  %v1365_v10 = vunpack.c.l.bf16 %v1355_v39  ;;  %v1366_v33 = vunpack.c.h.bf16 %v1355_v39  ;;  %782 = vst [vmem:[%s3335_s3 + $0x1f8] sm:$0xff] %v414_v8 }
  0xf2   :  { %v3367_v20 = vunpack.c.l.bf16 %v2559_v62  ;;  %v1499_v4 = vunpack.c.l.bf16 %v1489_v57  ;;  %v1500_v50 = vunpack.c.h.bf16 %v1489_v57  ;;  %v3369_v39 = vunpack.c.h.bf16 %v2559_v62  ;;  %v1755_v57 = vld [vmem:[%s3334_s2 + $0x10] sm:$0x88] }
  0xf3   :  { %v2671_v52 = vadd.f32 %v1337_v59, %v1327_v43  ;;  %v2685_v21 = vrot.slane %v1231_v0, %v2240_v56  ;;  %v2688_v43 = vrot.slane %v1232_v41, %v2240_v56  ;;  %v1367_v59 = vunpack.c.l.bf16 %v1356_v17 }
  0xf4   :  { %v2666_v22 = vrot.slane %v3367_v20, %v2369_v12  ;;  %v2679_v9 = vrot.slane %v3369_v39, %v2369_v12  ;;  %v1368_v25 = vunpack.c.h.bf16 %v1356_v17  ;;  %v2694_v62 = vrot.slane %v1099_v53, %v2231_v51 }
  0xf5   :  { %v2697_v20 = vrot.slane %v1100_v19, %v2231_v51  ;;  %v2700_v8 = vrot.slane %v1233_v28, %v2240_v56  ;;  %v2703_v0 = vrot.slane %v1234_v5, %v2240_v56  ;;  %v345_v41 = vpop.f32.mrb[12].mxu0  ;;  %v1369_v17 = vld [vmem:[%s3335_s3 + $0x180] sm:$0xff]  ;;  %v2709_v39 = vrot.slane %v1365_v10, %v2282_v11  ;;  %v1756_v56 = vld [vmem:[%s3334_s2 + $0x18] sm:$0x88] }
  0xf6   :  { %3368 = vst [vmem:[#allocation28_spill] sm:$0xff] %v2666_v22  ;;  %3370 = vst [vmem:[#allocation29_spill] sm:$0xff] %v2679_v9  ;;  %v2712_v53 = vrot.slane %v1366_v33, %v2282_v11  ;;  %v1501_v9 = vunpack.c.l.bf16 %v1490_v35  ;;  %v1502_v51 = vunpack.c.h.bf16 %v1490_v35  ;;  %v1623_v19 = vld [vmem:[%s3334_s2 + $0x20] sm:$0x88]  ;;  %v347_v28 = vpop.f32.mrb[13].mxu0  ;;  %v1370_v5 = vld [vmem:[%s3335_s3 + $0x188] sm:$0xff]  ;;  %v1429_v10 = vmul.f32 %v2315_v34, %v1369_v17 }
  0xf7   :  { %3371 = vst [vmem:[#allocation30_spill] sm:$0xff] %v2700_v8  ;;  %3372 = vst [vmem:[#allocation31_spill] sm:$0xff] %v2703_v0  ;;  %v2728_v33 = vrot.slane %v1499_v4, %v2294_v18  ;;  %v2731_v35 = vrot.slane %v1500_v50, %v2294_v18  ;;  %v2736_v22 = vld [vmem:[%s3334_s2 + $0x28] sm:$0x88]  ;;  %v1371_v34 = vld [vmem:[%s3335_s3 + $0x190] sm:$0xff]  ;;  %v2745_v4 = vrot.slane %v1367_v59, %v2282_v11 }
  0xf8   :  { %3373 = vst [vmem:[#allocation32_spill] sm:$0xff] %v2709_v39  ;;  %3374 = vst [vmem:[#allocation33_spill] sm:$0xff] %v2712_v53  ;;  %v1763_v53 = vunpack.c.l.bf16 %v1755_v57  ;;  %v418_v39 = vpop.f32.mrb[12].mxu1  ;;  %v2748_v50 = vrot.slane %v1368_v25, %v2282_v11  ;;  %v1430_v17 = vmul.f32 %v2318_v36, %v1370_v5  ;;  %v1372_v11 = vld [vmem:[%s3335_s3 + $0x198] sm:$0xff]  ;;  %v1504_v36 = vld [vmem:[%s3335_s3 + $0x1e8] sm:$0xff]  ;;  %v1633_v25 = vunpack.c.l.bf16 %v1623_v19 }
  0xf9   :  { %791 = vst [vmem:[%s3335_s3 + $0x240] sm:$0xff] %v345_v41  ;;  %3375 = vst [vmem:[#allocation34_spill] sm:$0xff] %v2728_v33  ;;  %v349_v41 = vpop.f32.mrb[14].mxu0  ;;  %v1764_v33 = vunpack.c.h.bf16 %v1755_v57  ;;  %v1634_v57 = vunpack.c.h.bf16 %v1623_v19  ;;  %v1765_v5 = vunpack.c.l.bf16 %v1756_v56  ;;  %v2777_v0 = vrot.slane %v1502_v51, %v2294_v18 }
  0xfa   :  { %3376 = vst [vmem:[#allocation35_spill] sm:$0xff] %v2731_v35  ;;  %792 = vst [vmem:[%s3335_s3 + $0x248] sm:$0xff] %v347_v28  ;;  %v1503_v35 = vld [vmem:[%s3335_s3 + $0x1e0] sm:$0xff]  ;;  %v351_v59 = vpop.f32.mrb[15].mxu0  ;;  %v420_v28 = vpop.f32.mrb[13].mxu1  ;;  %v1635_v19 = vunpack.c.l.bf16 %v2736_v22  ;;  %v1442_v8 = vadd.f32 %v1430_v17, %v1429_v10  ;;  %v1459_v51 = vmul.f32 %v1430_v17, %v1430_v17 }
  0xfb   :  { %3377 = vst [vmem:[#allocation36_spill] sm:$0xff] %v2745_v4  ;;  %3378 = vst [vmem:[#allocation37_spill] sm:$0xff] %v2748_v50  ;;  %v1766_v50 = vunpack.c.h.bf16 %v1756_v56  ;;  %v2774_v4 = vrot.slane %v1501_v9, %v2294_v18  ;;  %v1563_v9 = vmul.f32 %v2324_v38, %v1503_v35  ;;  %v1458_v18 = vmul.f32 %v1429_v10, %v1429_v10 }
  0xfc   :  { %803 = vst [vmem:[%s3335_s3 + $0x2a0] sm:$0xff] %v349_v41  ;;  %793 = vst [vmem:[%s3335_s3 + $0x250] sm:$0xff] %v418_v39  ;;  %v422_v39 = vpop.f32.mrb[14].mxu1  ;;  %v1431_v41 = vmul.f32 %v2321_v37, %v1371_v34  ;;  %v1505_v37 = vld [vmem:[%s3335_s3 + $0x1f0] sm:$0xff]  ;;  %v2789_v34 = vrot.slane %v1763_v53, %v2441_v31  ;;  %v2805_v38 = vrot.slane %v1765_v5, %v2441_v31 }
  0xfd   :  { %804 = vst [vmem:[%s3335_s3 + $0x2a8] sm:$0xff] %v351_v59  ;;  %794 = vst [vmem:[%s3335_s3 + $0x258] sm:$0xff] %v420_v28  ;;  %v424_v56 = vpop.f32.mrb[15].mxu1  ;;  %v1432_v59 = vmul.f32 %v2336_v48, %v1372_v11  ;;  %v1564_v28 = vmul.f32 %v2330_v44, %v1504_v36  ;;  %v2796_v48 = vrot.slane %v1764_v33, %v2441_v31  ;;  %v461_v35 = vpop.f32.mrb[16].mxu0 }
  0xfe   :  { %805 = vst [vmem:[%s3335_s3 + $0x2b0] sm:$0xff] %v422_v39  ;;  %3379 = vst [vmem:[#allocation38_spill] sm:$0xff] %v2789_v34  ;;  %v2799_v11 = vrot.slane %v1633_v25, %v2369_v12  ;;  %v2802_v39 = vrot.slane %v1634_v57, %v2369_v12  ;;  %v2808_v53 = vrot.slane %v1766_v50, %v2441_v31  ;;  %v463_v36 = vpop.f32.mrb[17].mxu0 }
  0xff   :  { %806 = vst [vmem:[%s3335_s3 + $0x2b8] sm:$0xff] %v424_v56  ;;  %3380 = vst [vmem:[#allocation39_spill] sm:$0xff] %v2796_v48  ;;  %v1460_v10 = vmul.f32 %v1431_v41, %v1431_v41  ;;  %v2811_v17 = vmul.f32 %v2339_v49, %v1505_v37  ;;  %v2815_v33 = vrot.slane %v1635_v19, %v2369_v12  ;;  %v465_v49 = vpop.f32.mrb[18].mxu0  ;;  %v534_v56 = vpop.f32.mrb[16].mxu1 }
 0x100   :  { %3381 = vst [vmem:[#allocation40_spill] sm:$0xff] %v2805_v38  ;;  %3382 = vst [vmem:[#allocation41_spill] sm:$0xff] %v2808_v53  ;;  %v897_v25 = vmul.f32 %v2348_v54, %v461_v35  ;;  %v1443_v57 = vadd.f32 %v1442_v8, %v1431_v41  ;;  %v2821_v50 = vmul.f32 %v1432_v59, %v1432_v59  ;;  %v467_v54 = vpop.f32.mrb[19].mxu0  ;;  %v536_v8 = vpop.f32.mrb[17].mxu1 }
 0x101   :  { %3383 = vst [vmem:[#allocation42_spill] sm:$0xff] %v2815_v33  ;;  %723 = vst [vmem:[%s3335_s3 + $0x20] sm:$0xff] %v461_v35  ;;  %v1592_v5 = vmul.f32 %v1563_v9, %v1563_v9  ;;  %v898_v19 = vmul.f32 %v2351_v55, %v463_v36  ;;  %v1470_v37 = vadd.f32 %v1459_v51, %v1458_v18 }
 0x102   :  { %724 = vst [vmem:[%s3335_s3 + $0x28] sm:$0xff] %v463_v36  ;;  %v2827_v44 = vadd.f32 %v1564_v28, %v1563_v9  ;;  %v1593_v53 = vmul.f32 %v1564_v28, %v1564_v28  ;;  %735 = vst [vmem:[%s3335_s3 + $0x80] sm:$0xff] %v465_v49  ;;  %v899_v41 = vmul.f32 %v2372_v13, %v534_v56  ;;  %v538_v9 = vpop.f32.mrb[18].mxu1 }
 0x103   :  { %725 = vst [vmem:[%s3335_s3 + $0x30] sm:$0xff] %v534_v56  ;;  %v909_v35 = vadd.f32 %v2564_v42, %v897_v25  ;;  %v1031_v55 = vmul.f32 %v2354_v61, %v465_v49  ;;  %v926_v18 = vmul.f32 %v897_v25, %v897_v25  ;;  %736 = vst [vmem:[%s3335_s3 + $0x88] sm:$0xff] %v467_v54  ;;  %v540_v61 = vpop.f32.mrb[19].mxu1 }
 0x104   :  { %726 = vst [vmem:[%s3335_s3 + $0x38] sm:$0xff] %v536_v8  ;;  %v900_v51 = vmul.f32 %v2375_v14, %v536_v8  ;;  %v1032_v28 = vmul.f32 %v2357_v63, %v467_v54  ;;  %v927_v36 = vmul.f32 %v898_v19, %v898_v19  ;;  %v2848_v13 = vmul.f32 %v2811_v17, %v2811_v17  ;;  %v3384_v63 = vld [vmem:[#allocation3_spill] sm:$0xff] }
 0x105   :  { %737 = vst [vmem:[%s3335_s3 + $0x90] sm:$0xff] %v538_v9  ;;  %v910_v42 = vadd.f32 %v909_v35, %v898_v19  ;;  %v1033_v25 = vmul.f32 %v2378_v15, %v538_v9  ;;  %v1043_v49 = vadd.f32 %v2576_v47, %v1031_v55  ;;  %v2855_v56 = vadd.f32 %v1443_v57, %v1432_v59  ;;  %v471_v35 = vpop.f32.mrb[20].mxu0 }
 0x106   :  { %738 = vst [vmem:[%s3335_s3 + $0x98] sm:$0xff] %v540_v61  ;;  %v1034_v14 = vmul.f32 %v3384_v63, %v540_v61  ;;  %v928_v54 = vmul.f32 %v899_v41, %v899_v41  ;;  %v937_v8 = vadd.f32 %v2586_v45, %v926_v18  ;;  %v1060_v38 = vmul.f32 %v1031_v55, %v1031_v55  ;;  %v473_v57 = vpop.f32.mrb[21].mxu0 }
 0x107   :  { %v911_v31 = vadd.f32 %v910_v42, %v899_v41  ;;  %v1044_v33 = vadd.f32 %v1043_v49, %v1032_v28  ;;  %v1061_v48 = vmul.f32 %v1032_v28, %v1032_v28  ;;  %v1471_v19 = vadd.f32 %v1470_v37, %v1460_v10  ;;  %747 = vst [vmem:[%s3335_s3 + $0xe0] sm:$0xff] %v471_v35  ;;  %v3385_v41 = vld [vmem:[#allocation4_spill] sm:$0xff]  ;;  %v475_v10 = vpop.f32.mrb[22].mxu0  ;;  %v544_v37 = vpop.f32.mrb[20].mxu1 }
 0x108   :  { %v929_v15 = vmul.f32 %v900_v51, %v900_v51  ;;  %v938_v9 = vadd.f32 %v937_v8, %v927_v36  ;;  %v1071_v47 = vadd.f32 %v2600_v58, %v1060_v38  ;;  %v2863_v59 = vadd.f32 %v1593_v53, %v1592_v5  ;;  %748 = vst [vmem:[%s3335_s3 + $0xe8] sm:$0xff] %v473_v57  ;;  %v3386_v5 = vld [vmem:[#allocation8_spill] sm:$0xff]  ;;  %v3387_v36 = vld [vmem:[#allocation11_spill] sm:$0xff] }
 0x109   :  { %v2868_v61 = vadd.f32 %v911_v31, %v900_v51  ;;  %v1045_v45 = vadd.f32 %v1044_v33, %v1033_v25  ;;  %v1062_v55 = vmul.f32 %v1033_v25, %v1033_v25  ;;  %v1165_v18 = vmul.f32 %v3385_v41, %v471_v35  ;;  %759 = vst [vmem:[%s3335_s3 + $0x140] sm:$0xff] %v475_v10  ;;  %v477_v31 = vpop.f32.mrb[23].mxu0  ;;  %v546_v33 = vpop.f32.mrb[21].mxu1  ;;  %v3388_v8 = vld [vmem:[#allocation12_spill] sm:$0xff]  ;;  %v3389_v41 = vld [vmem:[#allocation9_spill] sm:$0xff] }
 0x10a   :  { %v939_v58 = vadd.f32 %v938_v9, %v928_v54  ;;  %v1063_v38 = vmul.f32 %v1034_v14, %v1034_v14  ;;  %v1072_v53 = vadd.f32 %v1071_v47, %v1061_v48  ;;  %v1166_v28 = vmul.f32 %v3386_v5, %v473_v57  ;;  %749 = vst [vmem:[%s3335_s3 + $0xf0] sm:$0xff] %v544_v37  ;;  %v1637_v48 = vld [vmem:[%s3335_s3 + $0x240] sm:$0xff]  ;;  %v548_v63 = vpop.f32.mrb[22].mxu1  ;;  %v3391_v5 = vld [vmem:[#allocation5_spill] sm:$0xff] }
 0x10b   :  { %v2881_v51 = vadd.f32 %v1045_v45, %v1034_v14  ;;  %v1167_v42 = vmul.f32 %v3387_v36, %v544_v37  ;;  %v1177_v25 = vadd.f32 %v2620_v6, %v1165_v18  ;;  %v1194_v49 = vmul.f32 %v1165_v18, %v1165_v18  ;;  %760 = vst [vmem:[%s3335_s3 + $0x148] sm:$0xff] %v477_v31  ;;  %v550_v9 = vpop.f32.mrb[23].mxu1  ;;  %v3390_v37 = vld [vmem:[#allocation13_spill] sm:$0xff]  ;;  %v3392_v36 = vld [vmem:[#allocation14_spill] sm:$0xff] }
 0x10c   :  { %750 = vst [vmem:[%s3335_s3 + $0xf8] sm:$0xff] %v546_v33  ;;  %v2894_v14 = vadd.f32 %v939_v58, %v929_v15  ;;  %v1073_v54 = vadd.f32 %v1072_v53, %v1062_v55  ;;  %v1168_v35 = vmul.f32 %v3388_v8, %v546_v33  ;;  %v1195_v6 = vmul.f32 %v1166_v28, %v1166_v28  ;;  %v1638_v15 = vld [vmem:[%s3335_s3 + $0x248] sm:$0xff] }
 0x10d   :  { %761 = vst [vmem:[%s3335_s3 + $0x150] sm:$0xff] %v548_v63  ;;  %v1178_v47 = vadd.f32 %v1177_v25, %v1166_v28  ;;  %v1196_v57 = vmul.f32 %v1167_v42, %v1167_v42  ;;  %v1205_v45 = vadd.f32 %v2636_v60, %v1194_v49  ;;  %v1299_v18 = vmul.f32 %v3389_v41, %v475_v10  ;;  %v1639_v49 = vld [vmem:[%s3335_s3 + $0x250] sm:$0xff]  ;;  %v481_v8 = vpop.f32.mrb[24].mxu0  ;;  %v3393_v41 = vld [vmem:[#allocation15_spill] sm:$0xff] }
 0x10e   :  { %762 = vst [vmem:[%s3335_s3 + $0x158] sm:$0xff] %v550_v9  ;;  %v2908_v55 = vadd.f32 %v1073_v54, %v1063_v38  ;;  %v1300_v58 = vmul.f32 %v3390_v37, %v477_v31  ;;  %v1472_v53 = vadd.f32 %v1471_v19, %v2821_v50  ;;  %v1697_v28 = vmul.f32 %v3391_v5, %v1637_v48  ;;  %v3394_v31 = vld [vmem:[#allocation6_spill] sm:$0xff]  ;;  %v483_v50 = vpop.f32.mrb[25].mxu0  ;;  %v3397_v5 = vld [vmem:[#allocation7_spill] sm:$0xff] }
 0x10f   :  { %v1179_v33 = vadd.f32 %v1178_v47, %v1167_v42  ;;  %v1206_v60 = vadd.f32 %v1205_v45, %v1195_v6  ;;  %v1301_v10 = vmul.f32 %v3392_v36, %v548_v63  ;;  %v1311_v25 = vadd.f32 %v2647_v32, %v1299_v18  ;;  %771 = vst [vmem:[%s3335_s3 + $0x1a0] sm:$0xff] %v481_v8  ;;  %v485_v63 = vpop.f32.mrb[26].mxu0  ;;  %v554_v6 = vpop.f32.mrb[24].mxu1  ;;  %v3395_v47 = vld [vmem:[#allocation17_spill] sm:$0xff] }
 0x110   :  { %v1302_v38 = vmul.f32 %v3393_v41, %v550_v9  ;;  %v1328_v54 = vmul.f32 %v1299_v18, %v1299_v18  ;;  %v1329_v34 = vmul.f32 %v1300_v58, %v1300_v58  ;;  %v1698_v37 = vmul.f32 %v3394_v31, %v1638_v15  ;;  %772 = vst [vmem:[%s3335_s3 + $0x1a8] sm:$0xff] %v483_v50  ;;  %v3396_v18 = vld [vmem:[#allocation18_spill] sm:$0xff] }
 0x111   :  { %v2923_v19 = vadd.f32 %v1179_v33, %v1168_v35  ;;  %v1197_v42 = vmul.f32 %v1168_v35, %v1168_v35  ;;  %v1207_v32 = vadd.f32 %v1206_v60, %v1196_v57  ;;  %v1312_v48 = vadd.f32 %v1311_v25, %v1300_v58  ;;  %783 = vst [vmem:[%s3335_s3 + $0x200] sm:$0xff] %v485_v63  ;;  %v487_v35 = vpop.f32.mrb[27].mxu0  ;;  %v556_v57 = vpop.f32.mrb[25].mxu1  ;;  %v3398_v60 = vld [vmem:[#allocation19_spill] sm:$0xff] }
 0x112   :  { %v1339_v9 = vadd.f32 %v2671_v52, %v1328_v54  ;;  %v1433_v45 = vmul.f32 %v3395_v47, %v481_v8  ;;  %v1434_v15 = vmul.f32 %v3396_v18, %v483_v50  ;;  %v2932_v36 = vmul.f32 %v3397_v5, %v1639_v49  ;;  %773 = vst [vmem:[%s3335_s3 + $0x1b0] sm:$0xff] %v554_v6  ;;  %v558_v49 = vpop.f32.mrb[26].mxu1 }
 0x113   :  { %v2940_v58 = vadd.f32 %v1207_v32, %v1197_v42  ;;  %v1313_v52 = vadd.f32 %v1312_v48, %v1301_v10  ;;  %v1330_v33 = vmul.f32 %v1301_v10, %v1301_v10  ;;  %v1435_v25 = vmul.f32 %v3398_v60, %v554_v6  ;;  %784 = vst [vmem:[%s3335_s3 + $0x208] sm:$0xff] %v487_v35  ;;  %v1506_v10 = vld [vmem:[%s3335_s3 + $0x1f8] sm:$0xff]  ;;  %v560_v50 = vpop.f32.mrb[27].mxu1  ;;  %v3400_v60 = vld [vmem:[#allocation10_spill] sm:$0xff] }
 0x114   :  { %774 = vst [vmem:[%s3335_s3 + $0x1b8] sm:$0xff] %v556_v57  ;;  %v1331_v8 = vmul.f32 %v1302_v38, %v1302_v38  ;;  %v1340_v41 = vadd.f32 %v1339_v9, %v1329_v34  ;;  %v1445_v54 = vadd.f32 %v2855_v56, %v1433_v45  ;;  %v1462_v31 = vmul.f32 %v1433_v45, %v1433_v45  ;;  %v1640_v34 = vld [vmem:[%s3335_s3 + $0x258] sm:$0xff]  ;;  %v3399_v45 = vld [vmem:[#allocation2_spill] sm:$0xff] }
 0x115   :  { %785 = vst [vmem:[%s3335_s3 + $0x210] sm:$0xff] %v558_v49  ;;  %v2956_v42 = vadd.f32 %v1313_v52, %v1302_v38  ;;  %v1436_v32 = vmul.f32 %v2462_v40, %v556_v57  ;;  %v1463_v48 = vmul.f32 %v1434_v15, %v1434_v15  ;;  %v1726_v56 = vmul.f32 %v1697_v28, %v1697_v28  ;;  %v1771_v38 = vld [vmem:[%s3335_s3 + $0x2a0] sm:$0xff]  ;;  %v1772_v40 = vld [vmem:[%s3335_s3 + $0x2a8] sm:$0xff]  ;;  %v491_v52 = vpop.f32.mrb[28].mxu0 }
 0x116   :  { %786 = vst [vmem:[%s3335_s3 + $0x218] sm:$0xff] %v560_v50  ;;  %v1341_v63 = vadd.f32 %v1340_v41, %v1330_v33  ;;  %v1446_v6 = vadd.f32 %v1445_v54, %v1434_v15  ;;  %v1464_v9 = vmul.f32 %v1435_v25, %v1435_v25  ;;  %v1473_v47 = vadd.f32 %v1472_v53, %v1462_v31  ;;  %v493_v41 = vpop.f32.mrb[29].mxu0 }
 0x117   :  { %v1566_v18 = vmul.f32 %v3399_v45, %v1506_v10  ;;  %v1577_v5 = vadd.f32 %v2827_v44, %v2811_v17  ;;  %v1710_v35 = vadd.f32 %v1698_v37, %v1697_v28  ;;  %v1727_v57 = vmul.f32 %v1698_v37, %v1698_v37  ;;  %795 = vst [vmem:[%s3335_s3 + $0x260] sm:$0xff] %v491_v52  ;;  %v1773_v17 = vld [vmem:[%s3335_s3 + $0x2b0] sm:$0xff]  ;;  %v495_v37 = vpop.f32.mrb[30].mxu0 }
 0x118   :  { %v2974_v33 = vadd.f32 %v1341_v63, %v1331_v8  ;;  %v1447_v15 = vadd.f32 %v1446_v6, %v1435_v25  ;;  %v1474_v53 = vadd.f32 %v1473_v47, %v1463_v48  ;;  %v1700_v49 = vmul.f32 %v3400_v60, %v1640_v34  ;;  %796 = vst [vmem:[%s3335_s3 + $0x268] sm:$0xff] %v493_v41  ;;  %v564_v25 = vpop.f32.mrb[28].mxu1  ;;  %v1507_v48 = vld [vmem:[%s3335_s3 + $0x200] sm:$0xff] }
 0x119   :  { %v1728_v54 = vmul.f32 %v2932_v36, %v2932_v36  ;;  %v1738_v31 = vadd.f32 %v1727_v57, %v1726_v56  ;;  %v1831_v44 = vmul.f32 %v2468_v24, %v1771_v38  ;;  %v1832_v28 = vmul.f32 %v2476_v7, %v1772_v40  ;;  %807 = vst [vmem:[%s3335_s3 + $0x2c0] sm:$0xff] %v495_v37  ;;  %v497_v24 = vpop.f32.mrb[31].mxu0  ;;  %v566_v7 = vpop.f32.mrb[29].mxu1 }
 0x11a   :  { %v2990_v8 = vadd.f32 %v1447_v15, %v1436_v32  ;;  %v1465_v10 = vmul.f32 %v1436_v32, %v1436_v32  ;;  %v1475_v50 = vadd.f32 %v1474_v53, %v1464_v9  ;;  %v1605_v34 = vadd.f32 %v2863_v59, %v2848_v13  ;;  %797 = vst [vmem:[%s3335_s3 + $0x270] sm:$0xff] %v564_v25  ;;  %v1508_v32 = vld [vmem:[%s3335_s3 + $0x208] sm:$0xff]  ;;  %v568_v59 = vpop.f32.mrb[30].mxu1 }
 0x11b   :  { %v1567_v56 = vmul.f32 %v2465_v16, %v1507_v48  ;;  %v1578_v63 = vadd.f32 %v1577_v5, %v1566_v18  ;;  %v1595_v6 = vmul.f32 %v1566_v18, %v1566_v18  ;;  %v1711_v13 = vadd.f32 %v1710_v35, %v2932_v36  ;;  %808 = vst [vmem:[%s3335_s3 + $0x2c8] sm:$0xff] %v497_v24  ;;  %v3023_v36 = vld [vmem:[%s3334_s2 + $0x20] sm:$0x88]  ;;  %v570_v45 = vpop.f32.mrb[31].mxu1 }
 0x11c   :  { %798 = vst [vmem:[%s3335_s3 + $0x278] sm:$0xff] %v566_v7  ;;  %v3014_v9 = vadd.f32 %v1475_v50, %v1465_v10  ;;  %v1509_v47 = vld [vmem:[%s3335_s3 + $0x210] sm:$0xff]  ;;  %v1568_v16 = vmul.f32 %v2479_v23, %v1508_v32  ;;  %v1729_v38 = vmul.f32 %v1700_v49, %v1700_v49  ;;  %v1833_v40 = vmul.f32 %v2482_v27, %v1773_v17 }
 0x11d   :  { %809 = vst [vmem:[%s3335_s3 + $0x2d0] sm:$0xff] %v568_v59  ;;  %v1510_v18 = vld [vmem:[%s3335_s3 + $0x218] sm:$0xff]  ;;  %v1579_v5 = vadd.f32 %v1578_v63, %v1567_v56  ;;  %v1596_v35 = vmul.f32 %v1567_v56, %v1567_v56  ;;  %v1739_v23 = vadd.f32 %v1738_v31, %v1728_v54  ;;  %v1844_v57 = vadd.f32 %v1832_v28, %v1831_v44  ;;  %v607_v37 = vpop.f32.mrb[32].mxu0 }
 0x11e   :  { %810 = vst [vmem:[%s3335_s3 + $0x2d8] sm:$0xff] %v570_v45  ;;  %v1569_v52 = vmul.f32 %v2494_v26, %v1509_v47  ;;  %v3037_v27 = vmul.f32 %v2497_v30, %v1510_v18  ;;  %v1606_v15 = vadd.f32 %v1605_v34, %v1595_v6  ;;  %v3401_v53 = vunpack.c.h.bf16 %v2736_v22  ;;  %727 = vst [vmem:[%s3335_s3 + $0x40] sm:$0xff] %v607_v37  ;;  %v3402_v34 = vld [vmem:[#allocation21_spill] sm:$0xff]  ;;  %v1641_v56 = vld [vmem:[%s3335_s3 + $0x260] sm:$0xff] }
 0x11f   :  { %v1580_v41 = vadd.f32 %v1579_v5, %v1568_v16  ;;  %v3044_v17 = vadd.f32 %v1711_v13, %v1700_v49  ;;  %v1767_v54 = vunpack.c.l.bf16 %v3023_v36  ;;  %v1768_v31 = vunpack.c.h.bf16 %v3023_v36  ;;  %v3403_v13 = vld [vmem:[#allocation24_spill] sm:$0xff]  ;;  %v3405_v18 = vld [vmem:[#allocation25_spill] sm:$0xff] }
 0x120   :  { %v3042_v60 = vrot.slane %v3401_v53, %v2369_v12  ;;  %v1597_v25 = vmul.f32 %v1568_v16, %v1568_v16  ;;  %v1607_v10 = vadd.f32 %v1606_v15, %v1596_v35  ;;  %v3048_v26 = vmul.f32 %v1831_v44, %v1831_v44  ;;  %v609_v12 = vpop.f32.mrb[33].mxu0  ;;  %v3404_v16 = vld [vmem:[#allocation22_spill] sm:$0xff]  ;;  %v3406_v35 = vld [vmem:[#allocation23_spill] sm:$0xff] }
 0x121   :  { %v3050_v30 = vmul.f32 %v1832_v28, %v1832_v28  ;;  %v901_v22 = vmul.f32 %v2488_v29, %v607_v37  ;;  %v3056_v49 = vadd.f32 %v1739_v23, %v1729_v38  ;;  %v3058_v50 = vadd.f32 %v1844_v57, %v1833_v40  ;;  %728 = vst [vmem:[%s3335_s3 + $0x48] sm:$0xff] %v609_v12  ;;  %v611_v44 = vpop.f32.mrb[34].mxu0  ;;  %v680_v28 = vpop.f32.mrb[32].mxu1 }
 0x122   :  { %v3060_v48 = vmul.f32 %v1833_v40, %v1833_v40  ;;  %v902_v24 = vmul.f32 %v3402_v34, %v609_v12  ;;  %v3066_v7 = vadd.f32 %v1580_v41, %v1569_v52  ;;  %v1598_v32 = vmul.f32 %v1569_v52, %v1569_v52  ;;  %739 = vst [vmem:[%s3335_s3 + $0xa0] sm:$0xff] %v611_v44  ;;  %v613_v63 = vpop.f32.mrb[35].mxu0  ;;  %v682_v6 = vpop.f32.mrb[33].mxu1  ;;  %v3407_v41 = vld [vmem:[#allocation26_spill] sm:$0xff] }
 0x123   :  { %v3070_v29 = vmul.f32 %v3037_v27, %v3037_v27  ;;  %729 = vst [vmem:[%s3335_s3 + $0x50] sm:$0xff] %v680_v28  ;;  %v903_v59 = vmul.f32 %v3403_v13, %v680_v28  ;;  %v913_v47 = vadd.f32 %v2868_v61, %v901_v22  ;;  %v1035_v38 = vmul.f32 %v3404_v16, %v611_v44  ;;  %v684_v45 = vpop.f32.mrb[34].mxu1  ;;  %v1642_v61 = vld [vmem:[%s3335_s3 + $0x268] sm:$0xff] }
 0x124   :  { %v930_v40 = vmul.f32 %v901_v22, %v901_v22  ;;  %740 = vst [vmem:[%s3335_s3 + $0xa8] sm:$0xff] %v613_v63  ;;  %730 = vst [vmem:[%s3335_s3 + $0x58] sm:$0xff] %v682_v6  ;;  %v904_v5 = vmul.f32 %v3405_v18, %v682_v6  ;;  %v1036_v23 = vmul.f32 %v3406_v35, %v613_v63  ;;  %v686_v15 = vpop.f32.mrb[35].mxu1 }
 0x125   :  { %v931_v57 = vmul.f32 %v902_v24, %v902_v24  ;;  %v1608_v52 = vadd.f32 %v1607_v10, %v1597_v25  ;;  %741 = vst [vmem:[%s3335_s3 + $0xb0] sm:$0xff] %v684_v45  ;;  %v914_v53 = vadd.f32 %v913_v47, %v902_v24  ;;  %v1037_v37 = vmul.f32 %v3407_v41, %v684_v45  ;;  %v3408_v25 = vld [vmem:[#allocation27_spill] sm:$0xff] }
 0x126   :  { %v1047_v12 = vadd.f32 %v2881_v51, %v1035_v38  ;;  %v3101_v22 = vmul.f32 %v2562_v1, %v1641_v56  ;;  %742 = vst [vmem:[%s3335_s3 + $0xb8] sm:$0xff] %v686_v15  ;;  %v1038_v10 = vmul.f32 %v3408_v25, %v686_v15  ;;  %v932_v44 = vmul.f32 %v903_v59, %v903_v59  ;;  %v617_v51 = vpop.f32.mrb[36].mxu0 }
 0x127   :  { %v941_v28 = vadd.f32 %v2894_v14, %v930_v40  ;;  %v1064_v34 = vmul.f32 %v1035_v38, %v1035_v38  ;;  %v915_v63 = vadd.f32 %v914_v53, %v903_v59  ;;  %v1065_v24 = vmul.f32 %v1036_v23, %v1036_v23  ;;  %751 = vst [vmem:[%s3335_s3 + $0x100] sm:$0xff] %v617_v51  ;;  %v619_v45 = vpop.f32.mrb[37].mxu0  ;;  %v690_v40 = vpop.f32.mrb[36].mxu1 }
 0x128   :  { %v1048_v6 = vadd.f32 %v1047_v12, %v1036_v23  ;;  %v3109_v13 = vmul.f32 %v2625_v2, %v1642_v61  ;;  %v933_v47 = vmul.f32 %v904_v5, %v904_v5  ;;  %v1066_v56 = vmul.f32 %v1037_v37, %v1037_v37  ;;  %752 = vst [vmem:[%s3335_s3 + $0x108] sm:$0xff] %v619_v45  ;;  %v621_v2 = vpop.f32.mrb[38].mxu0 }
 0x129   :  { %v942_v1 = vadd.f32 %v941_v28, %v931_v57  ;;  %v1075_v16 = vadd.f32 %v2908_v55, %v1064_v34  ;;  %v916_v18 = vadd.f32 %v915_v63, %v904_v5  ;;  %v1067_v38 = vmul.f32 %v1038_v10, %v1038_v10  ;;  %763 = vst [vmem:[%s3335_s3 + $0x160] sm:$0xff] %v621_v2  ;;  %v692_v5 = vpop.f32.mrb[37].mxu1  ;;  %v3409_v34 = vld [vmem:[#allocation30_spill] sm:$0xff] }
 0x12a   :  { %v1049_v14 = vadd.f32 %v1048_v6, %v1037_v37  ;;  %v1169_v59 = vmul.f32 %v2618_v3, %v617_v51  ;;  %v1170_v55 = vmul.f32 %v2661_v46, %v619_v45  ;;  %v1609_v57 = vadd.f32 %v1608_v52, %v1598_v32  ;;  %753 = vst [vmem:[%s3335_s3 + $0x110] sm:$0xff] %v690_v40  ;;  %v623_v3 = vpop.f32.mrb[39].mxu0  ;;  %v694_v46 = vpop.f32.mrb[38].mxu1 }
 0x12b   :  { %v943_v35 = vadd.f32 %v942_v1, %v932_v44  ;;  %v1076_v23 = vadd.f32 %v1075_v16, %v1065_v24  ;;  %917 = vadd.xlane.f32.xlu0 %v916_v18  ;;  %v1171_v15 = vmul.f32 %v2694_v62, %v690_v40  ;;  %764 = vst [vmem:[%s3335_s3 + $0x168] sm:$0xff] %v623_v3  ;;  %754 = vst [vmem:[%s3335_s3 + $0x118] sm:$0xff] %v692_v5  ;;  %v696_v62 = vpop.f32.mrb[39].mxu1 }
 0x12c   :  { %v1050_v61 = vadd.f32 %v1049_v14, %v1038_v10  ;;  %v1181_v53 = vadd.f32 %v2923_v19, %v1169_v59  ;;  %v1198_v41 = vmul.f32 %v1169_v59, %v1169_v59  ;;  %v1172_v37 = vmul.f32 %v2697_v20, %v692_v5  ;;  %765 = vst [vmem:[%s3335_s3 + $0x170] sm:$0xff] %v694_v46 }
 0x12d   :  { %v944_v32 = vadd.f32 %v943_v35, %v933_v47  ;;  %v1077_v52 = vadd.f32 %v1076_v23, %v1066_v56  ;;  %v1199_v12 = vmul.f32 %v1170_v55, %v1170_v55  ;;  %v1200_v25 = vmul.f32 %v1171_v15, %v1171_v15  ;;  %766 = vst [vmem:[%s3335_s3 + $0x178] sm:$0xff] %v696_v62  ;;  %v3410_v47 = vld [vmem:[#allocation31_spill] sm:$0xff]  ;;  %v700_v59 = vpop.f32.mrb[40].mxu1  ;;  %v3412_v23 = vld [vmem:[#allocation33_spill] sm:$0xff] }
 0x12e   :  { %1051 = vadd.xlane.f32.xlu1 %v1050_v61  ;;  %v1182_v19 = vadd.f32 %v1181_v53, %v1170_v55  ;;  %v1209_v10 = vadd.f32 %v2940_v58, %v1198_v41  ;;  %v1303_v44 = vmul.f32 %v2685_v21, %v621_v2  ;;  %v1304_v20 = vmul.f32 %v2688_v43, %v623_v3  ;;  %v627_v21 = vpop.f32.mrb[40].mxu0 }
 0x12f   :  { %v1078_v28 = vadd.f32 %v1077_v52, %v1067_v38  ;;  %v1305_v63 = vmul.f32 %v3409_v34, %v694_v46  ;;  %v1582_v6 = vadd.f32 %v3066_v7, %v3037_v27  ;;  %945 = vadd.xlane.f32.xlu0 %v944_v32  ;;  %v1306_v1 = vmul.f32 %v3410_v47, %v696_v62  ;;  %v629_v43 = vpop.f32.mrb[41].mxu0 }
 0x130   :  { %v1183_v24 = vadd.f32 %v1182_v19, %v1171_v15  ;;  %v1210_v51 = vadd.f32 %v1209_v10, %v1199_v12  ;;  %v1315_v58 = vadd.f32 %v2956_v42, %v1303_v44  ;;  %v1201_v56 = vmul.f32 %v1172_v37, %v1172_v37  ;;  %775 = vst [vmem:[%s3335_s3 + $0x1c0] sm:$0xff] %v627_v21  ;;  %v631_v42 = vpop.f32.mrb[42].mxu0  ;;  %v3413_v15 = vld [vmem:[#allocation36_spill] sm:$0xff] }
 0x131   :  { %v1332_v16 = vmul.f32 %v1303_v44, %v1303_v44  ;;  %v1333_v45 = vmul.f32 %v1304_v20, %v1304_v20  ;;  %v1610_v18 = vadd.f32 %v1609_v57, %v3070_v29  ;;  %v1334_v38 = vmul.f32 %v1305_v63, %v1305_v63  ;;  %776 = vst [vmem:[%s3335_s3 + $0x1c8] sm:$0xff] %v629_v43  ;;  %v3411_v29 = vld [vmem:[#allocation32_spill] sm:$0xff]  ;;  %v702_v57 = vpop.f32.mrb[41].mxu1  ;;  %v633_v3 = vpop.f32.mrb[43].mxu0 }
 0x132   :  { %1079 = vadd.xlane.f32.xlu1 %v1078_v28  ;;  %v1184_v27 = vadd.f32 %v1183_v24, %v1172_v37  ;;  %v1211_v7 = vadd.f32 %v1210_v51, %v1200_v25  ;;  %v1316_v14 = vadd.f32 %v1315_v58, %v1304_v20  ;;  %v1335_v2 = vmul.f32 %v1306_v1, %v1306_v1  ;;  %v704_v46 = vpop.f32.mrb[42].mxu1  ;;  %v3415_v25 = vld [vmem:[#allocation37_spill] sm:$0xff]  ;;  %v3416_v28 = vld [vmem:[#allocation35_spill] sm:$0xff]  ;;  %v1643_v24 = vld [vmem:[%s3335_s3 + $0x270] sm:$0xff] }
 0x133   :  { %v1343_v40 = vadd.f32 %v2974_v33, %v1332_v16  ;;  %v1437_v35 = vmul.f32 %v3411_v29, %v627_v21  ;;  %v1438_v55 = vmul.f32 %v3412_v23, %v629_v43  ;;  %787 = vst [vmem:[%s3335_s3 + $0x220] sm:$0xff] %v631_v42  ;;  %777 = vst [vmem:[%s3335_s3 + $0x1d0] sm:$0xff] %v700_v59  ;;  %v3414_v33 = vld [vmem:[#allocation34_spill] sm:$0xff]  ;;  %v706_v62 = vpop.f32.mrb[43].mxu1  ;;  %v1644_v21 = vld [vmem:[%s3335_s3 + $0x278] sm:$0xff] }
 0x134   :  { %1185 = vadd.xlane.f32.xlu0 %v1184_v27  ;;  %v1212_v5 = vadd.f32 %v1211_v7, %v1201_v56  ;;  %v1317_v61 = vadd.f32 %v1316_v14, %v1305_v63  ;;  %v1439_v53 = vmul.f32 %v3413_v15, %v700_v59  ;;  %v1571_v41 = vmul.f32 %v3414_v33, %v631_v42  ;;  %v3417_v14 = vld [vmem:[#allocation28_spill] sm:$0xff]  ;;  %v3418_v29 = vld [vmem:[#allocation29_spill] sm:$0xff] }
 0x135   :  { %778 = vst [vmem:[%s3335_s3 + $0x1d8] sm:$0xff] %v702_v57  ;;  %788 = vst [vmem:[%s3335_s3 + $0x228] sm:$0xff] %v633_v3  ;;  %v1344_v32 = vadd.f32 %v1343_v40, %v1333_v45  ;;  %v1449_v52 = vadd.f32 %v2990_v8, %v1437_v35  ;;  %v1466_v37 = vmul.f32 %v1437_v35, %v1437_v35  ;;  %v637_v56 = vpop.f32.mrb[44].mxu0  ;;  %v710_v42 = vpop.f32.mrb[44].mxu1 }
 0x136   :  { %v1713_v12 = vadd.f32 %v3044_v17, %v3101_v22  ;;  %789 = vst [vmem:[%s3335_s3 + $0x230] sm:$0xff] %v704_v46  ;;  %1213 = vadd.xlane.f32.xlu1 %v1212_v5  ;;  %v1318_v19 = vadd.f32 %v1317_v61, %v1306_v1  ;;  %v1440_v10 = vmul.f32 %v3415_v25, %v702_v57  ;;  %790 = vst [vmem:[%s3335_s3 + $0x238] sm:$0xff] %v706_v62  ;;  %v639_v27 = vpop.f32.mrb[45].mxu0  ;;  %v1774_v5 = vld [vmem:[%s3335_s3 + $0x2b8] sm:$0xff]  ;;  %v3419_v25 = vld [vmem:[#allocation20_spill] sm:$0xff] }
 0x137   :  { %v1467_v44 = vmul.f32 %v1438_v55, %v1438_v55  ;;  %v1572_v20 = vmul.f32 %v3416_v28, %v633_v3  ;;  %v1345_v8 = vadd.f32 %v1344_v32, %v1334_v38  ;;  %v1450_v34 = vadd.f32 %v1449_v52, %v1438_v55  ;;  %799 = vst [vmem:[%s3335_s3 + $0x280] sm:$0xff] %v637_v56  ;;  %v3202_v38 = vpop.f32.mrb[46].mxu0  ;;  %v3218_v3 = vld [vmem:[%s3334_s2 + $0x28] sm:$0x88] }
 0x138   :  { %v1468_v63 = vmul.f32 %v1439_v53, %v1439_v53  ;;  %v1477_v17 = vadd.f32 %v3014_v9, %v1466_v37  ;;  %1319 = vadd.xlane.f32.xlu0 %v1318_v19  ;;  %v1573_v51 = vmul.f32 %v2774_v4, %v704_v46  ;;  %v1574_v47 = vmul.f32 %v2777_v0, %v706_v62 }
 0x139   :  { %v1583_v1 = vadd.f32 %v1582_v6, %v1571_v41  ;;  %v1600_v58 = vmul.f32 %v1571_v41, %v1571_v41  ;;  %v1346_v16 = vadd.f32 %v1345_v8, %v1335_v2  ;;  %v1451_v45 = vadd.f32 %v1450_v34, %v1439_v53  ;;  %800 = vst [vmem:[%s3335_s3 + $0x288] sm:$0xff] %v639_v27  ;;  %v3420_v34 = vld [vmem:[#allocation38_spill] sm:$0xff] }
 0x13a   :  { %v1478_v43 = vadd.f32 %v1477_v17, %v1467_v44  ;;  %v1601_v9 = vmul.f32 %v1572_v20, %v1572_v20  ;;  %v1703_v0 = vmul.f32 %v3417_v14, %v1643_v24  ;;  %v1872_v6 = vadd.f32 %v3050_v30, %v3048_v26  ;;  %811 = vst [vmem:[%s3335_s3 + $0x2e0] sm:$0xff] %v3202_v38  ;;  %v712_v26 = vpop.f32.mrb[45].mxu1  ;;  %v3212_v30 = vpop.f32.mrb[47].mxu0  ;;  %v3421_v17 = vld [vmem:[#allocation39_spill] sm:$0xff]  ;;  %v1778_v14 = vld [vmem:[%s3335_s3 + $0x2d8] sm:$0xff] }
 0x13b   :  { %v1584_v7 = vadd.f32 %v1583_v1, %v1572_v20  ;;  %v1611_v4 = vadd.f32 %v1610_v18, %v1600_v58  ;;  %1347 = vadd.xlane.f32.xlu1 %v1346_v16  ;;  %v1452_v59 = vadd.f32 %v1451_v45, %v1440_v10  ;;  %v1469_v2 = vmul.f32 %v1440_v10, %v1440_v10  ;;  %v3230_v61 = vpop.f32.mrb[46].mxu1  ;;  %v3423_v16 = vld [vmem:[#allocation16_spill] sm:$0xff] }
 0x13c   :  { %v1479_v40 = vadd.f32 %v1478_v43, %v1468_v63  ;;  %v1704_v35 = vmul.f32 %v3418_v29, %v1644_v21  ;;  %801 = vst [vmem:[%s3335_s3 + $0x290] sm:$0xff] %v710_v42  ;;  %v1602_v23 = vmul.f32 %v1573_v51, %v1573_v51  ;;  %v1714_v57 = vadd.f32 %v1713_v12, %v3109_v13  ;;  %v3239_v46 = vpop.f32.mrb[47].mxu1  ;;  %v3425_v29 = vld [vmem:[#allocation41_spill] sm:$0xff] }
 0x13d   :  { %v1585_v18 = vadd.f32 %v1584_v7, %v1573_v51  ;;  %v1612_v55 = vadd.f32 %v1611_v4, %v1601_v9  ;;  %802 = vst [vmem:[%s3335_s3 + $0x298] sm:$0xff] %v712_v26  ;;  %812 = vst [vmem:[%s3335_s3 + $0x2e8] sm:$0xff] %v3212_v30  ;;  %1453 = vadd.xlane.f32.xlu0 %v1452_v59  ;;  %v1603_v53 = vmul.f32 %v1574_v47, %v1574_v47 }
 0x13e   :  { %v1480_v15 = vadd.f32 %v1479_v40, %v1469_v2  ;;  %v1705_v33 = vmul.f32 %v2799_v11, %v637_v56  ;;  %v1730_v41 = vmul.f32 %v3101_v22, %v3101_v22  ;;  %813 = vst [vmem:[%s3335_s3 + $0x2f0] sm:$0xff] %v3230_v61  ;;  %v1715_v37 = vadd.f32 %v1714_v57, %v1703_v0  ;;  %v1775_v11 = vld [vmem:[%s3335_s3 + $0x2c0] sm:$0xff]  ;;  %v1776_v22 = vld [vmem:[%s3335_s3 + $0x2c8] sm:$0xff]  ;;  %v1777_v56 = vld [vmem:[%s3335_s3 + $0x2d0] sm:$0xff] }
 0x13f   :  { %v1586_v32 = vadd.f32 %v1585_v18, %v1574_v47  ;;  %v1613_v52 = vadd.f32 %v1612_v55, %v1602_v23  ;;  %v1731_v12 = vmul.f32 %v3109_v13, %v3109_v13  ;;  %814 = vst [vmem:[%s3335_s3 + $0x2f8] sm:$0xff] %v3239_v46  ;;  %v1706_v62 = vmul.f32 %v2802_v39, %v639_v27  ;;  %v3422_v47 = vld [vmem:[#allocation42_spill] sm:$0xff] }
 0x140   :  { %1481 = vadd.xlane.f32.xlu1 %v1480_v15  ;;  %v1769_v19 = vunpack.c.l.bf16 %v3218_v3  ;;  %v1770_v13 = vunpack.c.h.bf16 %v3218_v3  ;;  %v1834_v10 = vmul.f32 %v3419_v25, %v1774_v5  ;;  %v1716_v28 = vadd.f32 %v1715_v37, %v1704_v35 }
 0x141   :  { %v1614_v44 = vadd.f32 %v1613_v52, %v1603_v53  ;;  %v1732_v20 = vmul.f32 %v1703_v0, %v1703_v0  ;;  %v1741_v8 = vadd.f32 %v3056_v49, %v1730_v41  ;;  %1587 = vadd.xlane.f32.xlu0 %v1586_v32  ;;  %v1835_v63 = vmul.f32 %v3420_v34, %v1775_v11  ;;  %v3424_v0 = vld [vmem:[#allocation40_spill] sm:$0xff] }
 0x142   :  { %v1836_v24 = vmul.f32 %v3421_v17, %v1776_v22  ;;  %v1846_v51 = vadd.f32 %v3058_v50, %v1834_v10  ;;  %v1873_v39 = vadd.f32 %v1872_v6, %v3060_v48  ;;  %v1707_v1 = vmul.f32 %v3422_v47, %v710_v42 }
 0x143   :  { %v1717_v58 = vadd.f32 %v1716_v28, %v1705_v33  ;;  %v1742_v21 = vadd.f32 %v1741_v8, %v1731_v12  ;;  %v1818_v49 = vrot.slane %v1767_v54, %v3423_v16  ;;  %v1822_v45 = vrot.slane %v1768_v31, %v3423_v16 }
 0x144   :  { %1615 = vadd.xlane.f32.xlu1 %v1614_v44  ;;  %v1847_v50 = vadd.f32 %v1846_v51, %v1835_v63  ;;  %v1863_v43 = vmul.f32 %v1834_v10, %v1834_v10  ;;  %v1864_v48 = vmul.f32 %v1835_v63, %v1835_v63  ;;  %v1733_v27 = vmul.f32 %v1704_v35, %v1704_v35 }
 0x145   :  { %v1718_v9 = vadd.f32 %v1717_v58, %v1706_v62  ;;  %v1734_v7 = vmul.f32 %v1705_v33, %v1705_v33  ;;  %v1743_v4 = vadd.f32 %v1742_v21, %v1732_v20  ;;  %v1837_v6 = vmul.f32 %v3424_v0, %v1777_v56 }
 0x146   :  { %v1848_v42 = vadd.f32 %v1847_v50, %v1836_v24  ;;  %v1865_v54 = vmul.f32 %v1836_v24, %v1836_v24  ;;  %v1874_v59 = vadd.f32 %v1873_v39, %v1863_v43  ;;  %v1708_v2 = vmul.f32 %v3042_v60, %v712_v26 }
 0x147   :  { %v1719_v36 = vadd.f32 %v1718_v9, %v1707_v1  ;;  %v1735_v31 = vmul.f32 %v1706_v62, %v1706_v62  ;;  %v1744_v40 = vadd.f32 %v1743_v4, %v1733_v27  ;;  %v1838_v18 = vmul.f32 %v3425_v29, %v1778_v14 }
 0x148   :  { %v1839_v35 = vmul.f32 %v1818_v49, %v3202_v38  ;;  %v1849_v23 = vadd.f32 %v1848_v42, %v1837_v6  ;;  %v1875_v55 = vadd.f32 %v1874_v59, %v1864_v48  ;;  %v1736_v3 = vmul.f32 %v1707_v1, %v1707_v1 }
 0x149   :  { %v1720_v57 = vadd.f32 %v1719_v36, %v1708_v2  ;;  %v1745_v5 = vadd.f32 %v1744_v40, %v1734_v7  ;;  %v1826_v15 = vrot.slane %v1769_v19, %v3423_v16  ;;  %v1840_v53 = vmul.f32 %v1822_v45, %v3212_v30 }
 0x14a   :  { %v1850_v33 = vadd.f32 %v1849_v23, %v1838_v18  ;;  %v1866_v41 = vmul.f32 %v1837_v6, %v1837_v6  ;;  %v1876_v32 = vadd.f32 %v1875_v55, %v1865_v54  ;;  %v1830_v26 = vrot.slane %v1770_v13, %v3423_v16 }
 0x14b   :  { %1721 = vadd.xlane.f32.xlu0 %v1720_v57  ;;  %v1746_v60 = vadd.f32 %v1745_v5, %v1735_v31  ;;  %v1867_v37 = vmul.f32 %v1838_v18, %v1838_v18  ;;  %v1868_v12 = vmul.f32 %v1839_v35, %v1839_v35  ;;  %v1737_v11 = vmul.f32 %v1708_v2, %v1708_v2 }
 0x14c   :  { %v1851_v52 = vadd.f32 %v1850_v33, %v1839_v35  ;;  %v1877_v38 = vadd.f32 %v1876_v32, %v1866_v41  ;;  %v1841_v62 = vmul.f32 %v1826_v15, %v3230_v61  ;;  %v1869_v10 = vmul.f32 %v1840_v53, %v1840_v53 }
 0x14d   :  { %v1747_v22 = vadd.f32 %v1746_v60, %v1736_v3  ;;  %v1842_v30 = vmul.f32 %v1830_v26, %v3239_v46 }
 0x14e   :  { %v1852_v25 = vadd.f32 %v1851_v52, %v1840_v53  ;;  %v1878_v19 = vadd.f32 %v1877_v38, %v1867_v37  ;;  %v1870_v34 = vmul.f32 %v1841_v62, %v1841_v62 }
 0x14f   :  { %v1748_v44 = vadd.f32 %v1747_v22, %v1737_v11  ;;  %v1871_v63 = vmul.f32 %v1842_v30, %v1842_v30 }
 0x150   :  { %v1853_v28 = vadd.f32 %v1852_v25, %v1841_v62  ;;  %v1879_v20 = vadd.f32 %v1878_v19, %v1868_v12 }
 0x151   :  { %1749 = vadd.xlane.f32.xlu1 %v1748_v44 }
 0x152   :  { %v1854_v8 = vadd.f32 %v1853_v28, %v1842_v30  ;;  %v1880_v13 = vadd.f32 %v1879_v20, %v1869_v10 }
 0x154   :  { %1855 = vadd.xlane.f32.xlu0 %v1854_v8  ;;  %v1881_v17 = vadd.f32 %v1880_v13, %v1870_v34 }
 0x156   :  { %v1882_v24 = vadd.f32 %v1881_v17, %v1871_v63 }
 0x158   :  { %1883 = vadd.xlane.f32.xlu1 %v1882_v24 }
 0x1b8   :  { %v918_v51 = vpop.xlane.xlu0 %917 }
 0x1b9   :  { %920 = vst [vmem:[%s3336_s4] sm:$0xff] %v918_v51 }
 0x1bb   :  { %v1052_v39 = vpop.xlane.xlu1 %1051 }
 0x1bc   :  { %v946_v61 = vpop.xlane.xlu0 %945  ;;  %1054 = vst [vmem:[%s3336_s4 + $0x8] sm:$0xff] %v1052_v39 }
 0x1bd   :  { %948 = vst [vmem:[%s3337_s5] sm:$0xff] %v946_v61 }
 0x1bf   :  { %v1080_v46 = vpop.xlane.xlu1 %1079 }
 0x1c0   :  { %1082 = vst [vmem:[%s3337_s5 + $0x8] sm:$0xff] %v1080_v46 }
 0x1c1   :  { %v1186_v47 = vpop.xlane.xlu0 %1185 }
 0x1c2   :  { %1188 = vst [vmem:[%s3336_s4 + $0x10] sm:$0xff] %v1186_v47 }
 0x1c3   :  { %v1214_v1 = vpop.xlane.xlu1 %1213 }
 0x1c4   :  { %1216 = vst [vmem:[%s3337_s5 + $0x10] sm:$0xff] %v1214_v1 }
 0x1c5   :  { %v1320_v58 = vpop.xlane.xlu0 %1319 }
 0x1c6   :  { %1322 = vst [vmem:[%s3336_s4 + $0x18] sm:$0xff] %v1320_v58 }
 0x1c8   :  { %v1348_v21 = vpop.xlane.xlu1 %1347 }
 0x1c9   :  { %1350 = vst [vmem:[%s3337_s5 + $0x18] sm:$0xff] %v1348_v21 }
 0x1ca   :  { %v1454_v56 = vpop.xlane.xlu0 %1453 }
 0x1cb   :  { %1456 = vst [vmem:[%s3336_s4 + $0x20] sm:$0xff] %v1454_v56 }
 0x1cd   :  { %v1482_v16 = vpop.xlane.xlu1 %1481 }
 0x1ce   :  { %v1588_v49 = vpop.xlane.xlu0 %1587  ;;  %1484 = vst [vmem:[%s3337_s5 + $0x20] sm:$0xff] %v1482_v16 }
 0x1cf   :  { %1590 = vst [vmem:[%s3336_s4 + $0x28] sm:$0xff] %v1588_v49 }
 0x1d1   :  { %v1616_v45 = vpop.xlane.xlu1 %1615 }
 0x1d2   :  { %1618 = vst [vmem:[%s3337_s5 + $0x28] sm:$0xff] %v1616_v45 }
 0x1d8   :  { %v1722_v50 = vpop.xlane.xlu0 %1721 }
 0x1d9   :  { %1724 = vst [vmem:[%s3336_s4 + $0x30] sm:$0xff] %v1722_v50 }
 0x1de   :  { %v1750_v43 = vpop.xlane.xlu1 %1749 }
 0x1df   :  { %1752 = vst [vmem:[%s3337_s5 + $0x30] sm:$0xff] %v1750_v43 }
 0x1e1   :  { %v1856_v48 = vpop.xlane.xlu0 %1855 }
 0x1e2   :  { %1858 = vst [vmem:[%s3336_s4 + $0x38] sm:$0xff] %v1856_v48 }
 0x1e5   :  { %v1884_v9 = vpop.xlane.xlu1 %1883 }
 0x1e6   :  { %1886 = vst [vmem:[%s3337_s5 + $0x38] sm:$0xff] %v1884_v9 }

</bundles_post_ra>
